<compile_context>
chip_gen: v6e
topology: v6e:2x2x1
jax: 0.10.0
libtpu: 0.0.40
codegen_flags: <defaults>
</compile_context>

<pallas_src>
import math

import jax
import jax.numpy as jnp
from jax.experimental import pallas as pl
from jax.experimental.pallas import tpu as pltpu


def build_fused_lstm_kernel(dims, seq_len, seq_pad, batch_pad, time_chunk):
    """Fused multi-layer LSTM kernel for static (dims, seq_len, batch, chunk).

    Kernel ref order (grid = (num_chunks,), all times within a chunk processed in-kernel):
      inputs : xp0 chunk (Tc,B,3H1), wh0 (H1,3H1),
               then per layer l>=1: wx_l (I_l,3H_l), wh_l (H_l,3H_l), b_l (1,3H_l)
      outputs: out chunk (Tc,B,H_last), then (h_n, c_n) per layer -- h_n/c_n also serve as
               the carried recurrent state across chunks (constant index_map).
      scratch: one (Tc,B,H_l) VMEM buffer per non-final layer.
    """
    n_layers = len(dims) - 1
    needs_mask = seq_pad != seq_len
    unroll = int(min(time_chunk, 8))   # partial unroll: LLO visibility w/o vreg blowup

    def kernel(*refs):
        it = iter(refs)
        xp0_ref = next(it)                        # (Tc, B, 3*H1): x@Wx0 + b0 (+1 folded)
        wh_refs = [next(it)]                      # layer 0 recurrent weights (H1, 3*H1)
        wx_refs = [None]
        b_refs = [None]
        for _ in range(1, n_layers):
            wx_refs.append(next(it))              # (I_l, 3*H_l)
            wh_refs.append(next(it))              # (H_l, 3*H_l)
            b_refs.append(next(it))               # (1, 3*H_l), +1.0 folded into f slice
        out_ref = next(it)                        # (Tc, B, H_last)
        hn_refs, cn_refs = [], []
        for _ in range(n_layers):
            hn_refs.append(next(it))              # (B, H_l) -- doubles as carried h state
            cn_refs.append(next(it))              # (B, H_l) -- doubles as carried c state
        inter_refs = [next(it) for _ in range(n_layers - 1)]   # per-chunk (Tc, B, H_l)

        chunk = pl.program_id(0)

        @pl.when(chunk == 0)
        def _init_state():
            for l in range(n_layers):
                hn_refs[l][...] = jnp.zeros_like(hn_refs[l])
                cn_refs[l][...] = jnp.zeros_like(cn_refs[l])

        for l in range(n_layers):
            H = dims[l + 1]
            wh = wh_refs[l][...]                  # fused gate-major (H, 3H): f | o | g
            dst_ref = out_ref if l == n_layers - 1 else inter_refs[l]
            # TODO(synk): for production configs pick H as a multiple of 128 so the per-step
            # dst_ref[t] store is lane-dense (here H=32 -> masked 32/128-lane vst).

            if l == 0:
                # Layer-0 input projection precomputed in the wrapper: only h @ Wh here.
                def step(t, carry, wh=wh, dst_ref=dst_ref, H=H):
                    h, c = carry
                    pre = xp0_ref[t] + jnp.dot(h, wh, preferred_element_type=jnp.float32)
                    so = jax.nn.sigmoid(pre[:, : 2 * H])     # f and o in one EUP pass
                    f = so[:, :H]
                    o = so[:, H:]
                    g = jnp.tanh(pre[:, 2 * H:])
                    c_new = f * c + (1.0 - f) * g
                    h_new = o * jnp.tanh(c_new)
                    dst_ref[t] = h_new
                    if needs_mask:                 # padded tail timesteps don't advance state
                        valid = chunk * time_chunk + t < seq_len
                        h_new = jnp.where(valid, h_new, h)
                        c_new = jnp.where(valid, c_new, c)
                    return (h_new, c_new)
            else:
                wx = wx_refs[l][...]
                # Hoisted bias broadcast (JAX does not CSE broadcast_in_dim inside the loop).
                b = jnp.broadcast_to(b_refs[l][...], (batch_pad, 3 * H))
                src_ref = inter_refs[l - 1]

                def step(t, carry, wh=wh, wx=wx, b=b,
                         src_ref=src_ref, dst_ref=dst_ref, H=H):
                    h, c = carry
                    pre = (jnp.dot(src_ref[t], wx, preferred_element_type=jnp.float32)
                           + jnp.dot(h, wh, preferred_element_type=jnp.float32) + b)
                    so = jax.nn.sigmoid(pre[:, : 2 * H])
                    f = so[:, :H]
                    o = so[:, H:]
                    g = jnp.tanh(pre[:, 2 * H:])
                    c_new = f * c + (1.0 - f) * g
                    h_new = o * jnp.tanh(c_new)
                    dst_ref[t] = h_new
                    if needs_mask:
                        valid = chunk * time_chunk + t < seq_len
                        h_new = jnp.where(valid, h_new, h)
                        c_new = jnp.where(valid, c_new, c)
                    return (h_new, c_new)

            h0 = hn_refs[l][...]
            c0 = cn_refs[l][...]
            h_n, c_n = jax.lax.fori_loop(0, time_chunk, step, (h0, c0), unroll=unroll)
            hn_refs[l][...] = h_n
            cn_refs[l][...] = c_n

    return kernel


def prepare_lstm_params(raw_params, param_dtype=jnp.float32):
    """One-time (outside jit) conversion of PyTorch-layout params to fused kernel layout.

    raw weight (I+H, 3H) (columns already gate-major f|o|g), raw bias (3H,) ->
      wx_cat (I, 3H), wh_cat (H, 3H), b_cat (1, 3H) with the +1.0 forget-gate shift folded
      into b_cat[:, :H].
    `param_dtype=jnp.bfloat16` halves weight VMEM/DMA on v6e/v7x (accumulation stays f32);
    kept f32 here for close parity with the f32 reference.
    """
    prepared = []
    for w, b in raw_params:
        three_h = w.shape[1]
        H = three_h // 3
        I = w.shape[0] - H
        wx = w[:I, :].astype(param_dtype)
        wh = w[I:, :].astype(param_dtype)
        b_cat = b.reshape(1, three_h).at[0, :H].add(1.0).astype(jnp.float32)
        prepared.append((wx, wh, b_cat))
    return prepared


def _pick_time_chunk(seq_len, batch_pad, dims, budget_bytes=2 << 20, max_chunk=256):
    """Largest time chunk whose chunked buffers (xp0 slab + out slab + inter-layer scratch)
    stay within a modest VMEM budget; the whole sequence if it already fits."""
    per_t = 4 * batch_pad * (3 * dims[1] + dims[-1] + sum(dims[1:-1]))
    return int(max(1, min(seq_len, max_chunk, budget_bytes // max(per_t, 1))))


def _vmem_limit_bytes(time_chunk, batch_pad, dims, params):
    """Scoped VMEM request sized from the actual footprint, capped v7x-safe."""
    f32 = 4
    xp = 2 * time_chunk * batch_pad * 3 * dims[1] * f32      # double-buffered input chunk
    out = 2 * time_chunk * batch_pad * dims[-1] * f32        # double-buffered output chunk
    w = 2 * sum(int(a.size) * a.dtype.itemsize for p in params for a in p)
    state = 4 * batch_pad * sum(dims[1:]) * f32              # h_n / c_n resident blocks
    scr = time_chunk * batch_pad * sum(dims[1:-1]) * f32     # inter-layer scratch
    need = xp + out + w + state + scr + (8 << 20)            # compiler headroom
    return int(min(max(need, 32 << 20), 56 << 20))


def lstm_forward(x, params, *, time_chunk=None):
    """Multi-layer LSTM forward.  x: (S, B, dims[0]) time-major; params from prepare_lstm_params.

    Returns (output (S, B, H_last), [(h_n, c_n) per layer]).
    """
    # TODO(synk): the `length=` variable-batch truncation path and the layernorm / dropout
    # branches of the reference module are not implemented (defaults disable them).
    S, B, in_dim = x.shape
    assert S >= 1, "empty sequence not supported"
    n_layers = len(params)
    dims = [params[0][0].shape[0]] + [wh.shape[0] for (_, wh, _) in params]
    assert in_dim == dims[0]

    # Pad batch to a multiple of 8 sublanes (B=4 would waste half of every vreg / MXU row).
    B_pad = -(-B // 8) * 8
    if B_pad != B:
        x = jnp.pad(x, ((0, 0), (0, B_pad - B), (0, 0)))

    wx0, wh0, b0 = params[0]
    # Hoisted layer-0 input projection: the only throughput-scale matmul, done once over all
    # S*B rows with bias (+1.0 forget-gate shift) folded in.  Default MXU precision.
    xp0 = jnp.einsum('sbi,ih->sbh', x, wx0.astype(x.dtype)) + b0

    # Time chunking: VMEM footprint O(chunk) not O(S); chunk DMA overlaps the serial compute.
    if time_chunk is None:
        time_chunk = _pick_time_chunk(S, B_pad, dims)
    num_chunks = -(-S // time_chunk)
    S_pad = num_chunks * time_chunk
    if S_pad != S:
        xp0 = jnp.pad(xp0, ((0, S_pad - S), (0, 0), (0, 0)))

    inputs = [xp0, wh0]
    in_specs = [
        pl.BlockSpec((time_chunk, B_pad, 3 * dims[1]), lambda t: (t, 0, 0)),
        pl.BlockSpec(wh0.shape, lambda t: (0, 0)),
    ]
    for wx, wh, b in params[1:]:
        inputs += [wx, wh, b]
        in_specs += [pl.BlockSpec(wx.shape, lambda t: (0, 0)),
                     pl.BlockSpec(wh.shape, lambda t: (0, 0)),
                     pl.BlockSpec(b.shape, lambda t: (0, 0))]

    out_shapes = [jax.ShapeDtypeStruct((S_pad, B_pad, dims[-1]), jnp.float32)]
    out_specs = [pl.BlockSpec((time_chunk, B_pad, dims[-1]), lambda t: (t, 0, 0))]
    for H in dims[1:]:
        for _ in range(2):   # h_n, c_n (VMEM-resident across chunks: carried state)
            out_shapes.append(jax.ShapeDtypeStruct((B_pad, H), jnp.float32))
            out_specs.append(pl.BlockSpec((B_pad, H), lambda t: (0, 0)))

    scratch = [pltpu.VMEM((time_chunk, B_pad, H), jnp.float32) for H in dims[1:-1]]

    kernel = build_fused_lstm_kernel(tuple(dims), S, S_pad, B_pad, time_chunk)
    results = pl.pallas_call(
        kernel,
        out_shape=tuple(out_shapes),
        grid_spec=pltpu.PrefetchScalarGridSpec(
            num_scalar_prefetch=0,
            grid=(num_chunks,),
            in_specs=in_specs,
            out_specs=tuple(out_specs),
            scratch_shapes=scratch,
        ),
        compiler_params=pltpu.CompilerParams(
            dimension_semantics=("arbitrary",),   # sequential recurrence across chunks
            vmem_limit_bytes=_vmem_limit_bytes(time_chunk, B_pad, dims, params),
        ),
    )(*inputs)

    output = results[0][:S, :B]
    new_hxs = [(results[1 + 2 * l][:B], results[2 + 2 * l][:B]) for l in range(n_layers)]
    return output, new_hxs


def init_lstm_params(key, dims):
    """Deterministic init matching LSTMCell.reset_parameters (uniform(-stdv, stdv))."""
    params = []
    for input_size, hidden_size in zip(dims[:-1], dims[1:]):
        key, kw, kb = jax.random.split(key, 3)
        stdv = 1.0 / math.sqrt(hidden_size)
        w = jax.random.uniform(kw, (input_size + hidden_size, 3 * hidden_size),
                               jnp.float32, minval=-stdv, maxval=stdv)
        b = jax.random.uniform(kb, (3 * hidden_size,),
                               jnp.float32, minval=-stdv, maxval=stdv)
        params.append((w, b))
    return params


def lstm_reference(x, raw_params):
    """Pure-JAX reference matching the PyTorch module (for correctness checking)."""
    inp = x
    new_hxs = []
    for w, b in raw_params:
        H = w.shape[1] // 3
        B = inp.shape[1]

        def step(carry, x_t, w=w, b=b, H=H):
            h, c = carry
            pre = jnp.dot(jnp.concatenate([x_t, h], axis=1), w,
                          precision=jax.lax.Precision.HIGHEST) + b
            f = jax.nn.sigmoid(pre[:, :H] + 1.0)
            o = jax.nn.sigmoid(pre[:, H:2 * H])
            g = jnp.tanh(pre[:, 2 * H:])
            c = f * c + (1.0 - f) * g
            h = o * jnp.tanh(c)
            return (h, c), h

        init = (jnp.zeros((B, H), jnp.float32), jnp.zeros((B, H), jnp.float32))
        (h_n, c_n), outs = jax.lax.scan(step, init, inp)
        new_hxs.append((h_n, c_n))
        inp = outs
    return inp, new_hxs


if __name__ == "__main__":
    # dims = [16, 32, 32] -> 2-layer LSTM; seq=8, batch=4, time-major input.
    dims = [16, 32, 32]
    S, B = 8, 4

    key = jax.random.PRNGKey(0)
    kx, kp = jax.random.split(key)
    x = jax.random.normal(kx, (S, B, dims[0]), jnp.float32)
    raw_params = init_lstm_params(kp, dims)
    params = prepare_lstm_params(raw_params)          # one-time, outside jit

    output, new_hxs = jax.jit(lstm_forward)(x, params)
    jax.block_until_ready(output)
    for h, c in new_hxs:
        jax.block_until_ready(h)
        jax.block_until_ready(c)

    assert output.shape == (S, B, dims[-1])
    assert all(h.shape == (B, hs) and c.shape == (B, hs)
               for (h, c), hs in zip(new_hxs, dims[1:]))

    # Correctness check vs. pure-JAX reference (loose tol: MXU default-precision f32
    # accumulation differs from the HIGHEST-precision reference dot).
    ref_out, ref_hxs = jax.jit(lstm_reference)(x, raw_params)
    assert float(jnp.max(jnp.abs(output - ref_out))) < 2e-2
    for (h, c), (hr, cr) in zip(new_hxs, ref_hxs):
        assert float(jnp.max(jnp.abs(h - hr))) < 2e-2
        assert float(jnp.max(jnp.abs(c - cr))) < 2e-2

    print("KERNEL_OK")
</pallas_src>

<mosaic_0001>
module attributes {stable_mosaic.version = 11 : i64} {
  func.func @kernel(%arg0: i32, %arg1: memref<8x8x96xf32, #tpu.memory_space<vmem>>, %arg2: memref<32x96xf32, #tpu.memory_space<vmem>>, %arg3: memref<32x96xf32, #tpu.memory_space<vmem>>, %arg4: memref<32x96xf32, #tpu.memory_space<vmem>>, %arg5: memref<1x96xf32, #tpu.memory_space<vmem>>, %arg6: memref<8x8x32xf32, #tpu.memory_space<vmem>>, %arg7: memref<8x32xf32, #tpu.memory_space<vmem>>, %arg8: memref<8x32xf32, #tpu.memory_space<vmem>>, %arg9: memref<8x32xf32, #tpu.memory_space<vmem>>, %arg10: memref<8x32xf32, #tpu.memory_space<vmem>>, %arg11: memref<8x8x32xf32, #tpu.memory_space<vmem>>) attributes {dimension_semantics = [#tpu.dimension_semantics<arbitrary>], iteration_bounds = array<i64: 1>, scalar_prefetch = 0 : i64, scratch_operands = 1 : i64, tpu.core_type = #tpu.core_type<tc>, window_params = [{transform_indices = @transform_0, window_bounds = array<i64: 8, 8, 96>}, {pipeline_mode = #tpu.pipeline_mode<synchronous>, transform_indices = @transform_1, window_bounds = array<i64: 32, 96>}, {pipeline_mode = #tpu.pipeline_mode<synchronous>, transform_indices = @transform_2, window_bounds = array<i64: 32, 96>}, {pipeline_mode = #tpu.pipeline_mode<synchronous>, transform_indices = @transform_3, window_bounds = array<i64: 32, 96>}, {pipeline_mode = #tpu.pipeline_mode<synchronous>, transform_indices = @transform_4, window_bounds = array<i64: 1, 96>}, {transform_indices = @transform_5, window_bounds = array<i64: 8, 8, 32>}, {pipeline_mode = #tpu.pipeline_mode<synchronous>, transform_indices = @transform_6, window_bounds = array<i64: 8, 32>}, {pipeline_mode = #tpu.pipeline_mode<synchronous>, transform_indices = @transform_7, window_bounds = array<i64: 8, 32>}, {pipeline_mode = #tpu.pipeline_mode<synchronous>, transform_indices = @transform_8, window_bounds = array<i64: 8, 32>}, {pipeline_mode = #tpu.pipeline_mode<synchronous>, transform_indices = @transform_9, window_bounds = array<i64: 8, 32>}]} {
    %c0_i32 = arith.constant 0 : i32
    %0 = arith.cmpi eq, %arg0, %c0_i32 : i32
    %1 = arith.extui %0 : i1 to i32
    %c0_i32_0 = arith.constant 0 : i32
    %2 = arith.cmpi ne, %1, %c0_i32_0 : i32
    scf.if %2 {
      %cst_153 = arith.constant 0.000000e+00 : f32
      %449 = vector.broadcast %cst_153 : f32 to vector<8x32xf32>
      %c0_154 = arith.constant 0 : index
      %c0_155 = arith.constant 0 : index
      %450 = vector.load %arg7[%c0_154, %c0_155] : memref<8x32xf32, #tpu.memory_space<vmem>>, vector<8x32xf32>
      tpu.vector_store %arg7[%c0_154, %c0_155], %449 {strides = array<i32>} : memref<8x32xf32, #tpu.memory_space<vmem>>, vector<8x32xf32>,
      %cst_156 = arith.constant 0.000000e+00 : f32
      %451 = vector.broadcast %cst_156 : f32 to vector<8x32xf32>
      %c0_157 = arith.constant 0 : index
      %c0_158 = arith.constant 0 : index
      %452 = vector.load %arg8[%c0_157, %c0_158] : memref<8x32xf32, #tpu.memory_space<vmem>>, vector<8x32xf32>
      tpu.vector_store %arg8[%c0_157, %c0_158], %451 {strides = array<i32>} : memref<8x32xf32, #tpu.memory_space<vmem>>, vector<8x32xf32>,
      %cst_159 = arith.constant 0.000000e+00 : f32
      %453 = vector.broadcast %cst_159 : f32 to vector<8x32xf32>
      %c0_160 = arith.constant 0 : index
      %c0_161 = arith.constant 0 : index
      %454 = vector.load %arg9[%c0_160, %c0_161] : memref<8x32xf32, #tpu.memory_space<vmem>>, vector<8x32xf32>
      tpu.vector_store %arg9[%c0_160, %c0_161], %453 {strides = array<i32>} : memref<8x32xf32, #tpu.memory_space<vmem>>, vector<8x32xf32>,
      %cst_162 = arith.constant 0.000000e+00 : f32
      %455 = vector.broadcast %cst_162 : f32 to vector<8x32xf32>
      %c0_163 = arith.constant 0 : index
      %c0_164 = arith.constant 0 : index
      %456 = vector.load %arg10[%c0_163, %c0_164] : memref<8x32xf32, #tpu.memory_space<vmem>>, vector<8x32xf32>
      tpu.vector_store %arg10[%c0_163, %c0_164], %455 {strides = array<i32>} : memref<8x32xf32, #tpu.memory_space<vmem>>, vector<8x32xf32>,
    } else {
    }
    %c0 = arith.constant 0 : index
    %c0_1 = arith.constant 0 : index
    %3 = vector.load %arg2[%c0, %c0_1] : memref<32x96xf32, #tpu.memory_space<vmem>>, vector<32x96xf32>
    %c0_2 = arith.constant 0 : index
    %c0_3 = arith.constant 0 : index
    %4 = vector.load %arg7[%c0_2, %c0_3] : memref<8x32xf32, #tpu.memory_space<vmem>>, vector<8x32xf32>
    %c0_4 = arith.constant 0 : index
    %c0_5 = arith.constant 0 : index
    %5 = vector.load %arg8[%c0_4, %c0_5] : memref<8x32xf32, #tpu.memory_space<vmem>>, vector<8x32xf32>
    %c0_i32_6 = arith.constant 0 : i32
    %6 = arith.index_cast %c0_i32_6 : i32 to index
    %c0_7 = arith.constant 0 : index
    %c0_8 = arith.constant 0 : index
    %7 = vector.load %arg1[%6, %c0_7, %c0_8] : memref<8x8x96xf32, #tpu.memory_space<vmem>>, vector<1x8x96xf32>
    %8 = vector.shape_cast %7 : vector<1x8x96xf32> to vector<8x96xf32>
    %cst = arith.constant dense<0.000000e+00> : vector<8x96xf32>
    %9 = tpu.matmul %4, %3, %cst {dimension_numbers = #tpu.dot_dimension_numbers<[1], [0], [0], [1], [0, 0, 1, 1], [], []>} : vector<8x32xf32>, vector<32x96xf32>, vector<8x96xf32> -> vector<8x96xf32>
    %10 = arith.addf %8, %9 : vector<8x96xf32>
    %11 = vector.extract_strided_slice %10 {offsets = [0, 0], sizes = [8, 64], strides = [1, 1]} : vector<8x96xf32> to vector<8x64xf32>
    %12 = arith.negf %11 : vector<8x64xf32>
    %13 = math.exp %12 : vector<8x64xf32>
    %cst_9 = arith.constant 1.000000e+00 : f32
    %14 = vector.broadcast %cst_9 : f32 to vector<8x64xf32>
    %15 = arith.addf %14, %13 : vector<8x64xf32>
    %16 = arith.divf %14, %15 : vector<8x64xf32>
    %17 = vector.extract_strided_slice %16 {offsets = [0, 0], sizes = [8, 32], strides = [1, 1]} : vector<8x64xf32> to vector<8x32xf32>
    %18 = vector.extract_strided_slice %16 {offsets = [0, 32], sizes = [8, 32], strides = [1, 1]} : vector<8x64xf32> to vector<8x32xf32>
    %19 = vector.extract_strided_slice %10 {offsets = [0, 64], sizes = [8, 32], strides = [1, 1]} : vector<8x96xf32> to vector<8x32xf32>
    %20 = math.tanh %19 : vector<8x32xf32>
    %21 = arith.mulf %17, %5 : vector<8x32xf32>
    %cst_10 = arith.constant 1.000000e+00 : f32
    %22 = vector.broadcast %cst_10 : f32 to vector<8x32xf32>
    %23 = arith.subf %22, %17 : vector<8x32xf32>
    %24 = arith.mulf %23, %20 : vector<8x32xf32>
    %25 = arith.addf %21, %24 : vector<8x32xf32>
    %26 = math.tanh %25 : vector<8x32xf32>
    %27 = arith.mulf %18, %26 : vector<8x32xf32>
    %28 = arith.index_cast %c0_i32_6 : i32 to index
    %c0_11 = arith.constant 0 : index
    %c0_12 = arith.constant 0 : index
    %29 = vector.load %arg11[%28, %c0_11, %c0_12] : memref<8x8x32xf32, #tpu.memory_space<vmem>>, vector<1x8x32xf32>
    %30 = vector.shape_cast %29 : vector<1x8x32xf32> to vector<8x32xf32>
    %31 = vector.shape_cast %27 : vector<8x32xf32> to vector<1x8x32xf32>
    tpu.vector_store %arg11[%28, %c0_11, %c0_12], %31 {strides = array<i32>} : memref<8x8x32xf32, #tpu.memory_space<vmem>>, vector<1x8x32xf32>,
    %c1_i32 = arith.constant 1 : i32
    %32 = arith.index_cast %c1_i32 : i32 to index
    %c0_13 = arith.constant 0 : index
    %c0_14 = arith.constant 0 : index
    %33 = vector.load %arg1[%32, %c0_13, %c0_14] : memref<8x8x96xf32, #tpu.memory_space<vmem>>, vector<1x8x96xf32>
    %34 = vector.shape_cast %33 : vector<1x8x96xf32> to vector<8x96xf32>
    %cst_15 = arith.constant dense<0.000000e+00> : vector<8x96xf32>
    %35 = tpu.matmul %27, %3, %cst_15 {dimension_numbers = #tpu.dot_dimension_numbers<[1], [0], [0], [1], [0, 0, 1, 1], [], []>} : vector<8x32xf32>, vector<32x96xf32>, vector<8x96xf32> -> vector<8x96xf32>
    %36 = arith.addf %34, %35 : vector<8x96xf32>
    %37 = vector.extract_strided_slice %36 {offsets = [0, 0], sizes = [8, 64], strides = [1, 1]} : vector<8x96xf32> to vector<8x64xf32>
    %38 = arith.negf %37 : vector<8x64xf32>
    %39 = math.exp %38 : vector<8x64xf32>
    %cst_16 = arith.constant 1.000000e+00 : f32
    %40 = vector.broadcast %cst_16 : f32 to vector<8x64xf32>
    %41 = arith.addf %40, %39 : vector<8x64xf32>
    %42 = arith.divf %40, %41 : vector<8x64xf32>
    %43 = vector.extract_strided_slice %42 {offsets = [0, 0], sizes = [8, 32], strides = [1, 1]} : vector<8x64xf32> to vector<8x32xf32>
    %44 = vector.extract_strided_slice %42 {offsets = [0, 32], sizes = [8, 32], strides = [1, 1]} : vector<8x64xf32> to vector<8x32xf32>
    %45 = vector.extract_strided_slice %36 {offsets = [0, 64], sizes = [8, 32], strides = [1, 1]} : vector<8x96xf32> to vector<8x32xf32>
    %46 = math.tanh %45 : vector<8x32xf32>
    %47 = arith.mulf %43, %25 : vector<8x32xf32>
    %cst_17 = arith.constant 1.000000e+00 : f32
    %48 = vector.broadcast %cst_17 : f32 to vector<8x32xf32>
    %49 = arith.subf %48, %43 : vector<8x32xf32>
    %50 = arith.mulf %49, %46 : vector<8x32xf32>
    %51 = arith.addf %47, %50 : vector<8x32xf32>
    %52 = math.tanh %51 : vector<8x32xf32>
    %53 = arith.mulf %44, %52 : vector<8x32xf32>
    %54 = arith.index_cast %c1_i32 : i32 to index
    %c0_18 = arith.constant 0 : index
    %c0_19 = arith.constant 0 : index
    %55 = vector.load %arg11[%54, %c0_18, %c0_19] : memref<8x8x32xf32, #tpu.memory_space<vmem>>, vector<1x8x32xf32>
    %56 = vector.shape_cast %55 : vector<1x8x32xf32> to vector<8x32xf32>
    %57 = vector.shape_cast %53 : vector<8x32xf32> to vector<1x8x32xf32>
    tpu.vector_store %arg11[%54, %c0_18, %c0_19], %57 {strides = array<i32>} : memref<8x8x32xf32, #tpu.memory_space<vmem>>, vector<1x8x32xf32>,
    %c2_i32 = arith.constant 2 : i32
    %58 = arith.index_cast %c2_i32 : i32 to index
    %c0_20 = arith.constant 0 : index
    %c0_21 = arith.constant 0 : index
    %59 = vector.load %arg1[%58, %c0_20, %c0_21] : memref<8x8x96xf32, #tpu.memory_space<vmem>>, vector<1x8x96xf32>
    %60 = vector.shape_cast %59 : vector<1x8x96xf32> to vector<8x96xf32>
    %cst_22 = arith.constant dense<0.000000e+00> : vector<8x96xf32>
    %61 = tpu.matmul %53, %3, %cst_22 {dimension_numbers = #tpu.dot_dimension_numbers<[1], [0], [0], [1], [0, 0, 1, 1], [], []>} : vector<8x32xf32>, vector<32x96xf32>, vector<8x96xf32> -> vector<8x96xf32>
    %62 = arith.addf %60, %61 : vector<8x96xf32>
    %63 = vector.extract_strided_slice %62 {offsets = [0, 0], sizes = [8, 64], strides = [1, 1]} : vector<8x96xf32> to vector<8x64xf32>
    %64 = arith.negf %63 : vector<8x64xf32>
    %65 = math.exp %64 : vector<8x64xf32>
    %cst_23 = arith.constant 1.000000e+00 : f32
    %66 = vector.broadcast %cst_23 : f32 to vector<8x64xf32>
    %67 = arith.addf %66, %65 : vector<8x64xf32>
    %68 = arith.divf %66, %67 : vector<8x64xf32>
    %69 = vector.extract_strided_slice %68 {offsets = [0, 0], sizes = [8, 32], strides = [1, 1]} : vector<8x64xf32> to vector<8x32xf32>
    %70 = vector.extract_strided_slice %68 {offsets = [0, 32], sizes = [8, 32], strides = [1, 1]} : vector<8x64xf32> to vector<8x32xf32>
    %71 = vector.extract_strided_slice %62 {offsets = [0, 64], sizes = [8, 32], strides = [1, 1]} : vector<8x96xf32> to vector<8x32xf32>
    %72 = math.tanh %71 : vector<8x32xf32>
    %73 = arith.mulf %69, %51 : vector<8x32xf32>
    %cst_24 = arith.constant 1.000000e+00 : f32
    %74 = vector.broadcast %cst_24 : f32 to vector<8x32xf32>
    %75 = arith.subf %74, %69 : vector<8x32xf32>
    %76 = arith.mulf %75, %72 : vector<8x32xf32>
    %77 = arith.addf %73, %76 : vector<8x32xf32>
    %78 = math.tanh %77 : vector<8x32xf32>
    %79 = arith.mulf %70, %78 : vector<8x32xf32>
    %80 = arith.index_cast %c2_i32 : i32 to index
    %c0_25 = arith.constant 0 : index
    %c0_26 = arith.constant 0 : index
    %81 = vector.load %arg11[%80, %c0_25, %c0_26] : memref<8x8x32xf32, #tpu.memory_space<vmem>>, vector<1x8x32xf32>
    %82 = vector.shape_cast %81 : vector<1x8x32xf32> to vector<8x32xf32>
    %83 = vector.shape_cast %79 : vector<8x32xf32> to vector<1x8x32xf32>
    tpu.vector_store %arg11[%80, %c0_25, %c0_26], %83 {strides = array<i32>} : memref<8x8x32xf32, #tpu.memory_space<vmem>>, vector<1x8x32xf32>,
    %c3_i32 = arith.constant 3 : i32
    %84 = arith.index_cast %c3_i32 : i32 to index
    %c0_27 = arith.constant 0 : index
    %c0_28 = arith.constant 0 : index
    %85 = vector.load %arg1[%84, %c0_27, %c0_28] : memref<8x8x96xf32, #tpu.memory_space<vmem>>, vector<1x8x96xf32>
    %86 = vector.shape_cast %85 : vector<1x8x96xf32> to vector<8x96xf32>
    %cst_29 = arith.constant dense<0.000000e+00> : vector<8x96xf32>
    %87 = tpu.matmul %79, %3, %cst_29 {dimension_numbers = #tpu.dot_dimension_numbers<[1], [0], [0], [1], [0, 0, 1, 1], [], []>} : vector<8x32xf32>, vector<32x96xf32>, vector<8x96xf32> -> vector<8x96xf32>
    %88 = arith.addf %86, %87 : vector<8x96xf32>
    %89 = vector.extract_strided_slice %88 {offsets = [0, 0], sizes = [8, 64], strides = [1, 1]} : vector<8x96xf32> to vector<8x64xf32>
    %90 = arith.negf %89 : vector<8x64xf32>
    %91 = math.exp %90 : vector<8x64xf32>
    %cst_30 = arith.constant 1.000000e+00 : f32
    %92 = vector.broadcast %cst_30 : f32 to vector<8x64xf32>
    %93 = arith.addf %92, %91 : vector<8x64xf32>
    %94 = arith.divf %92, %93 : vector<8x64xf32>
    %95 = vector.extract_strided_slice %94 {offsets = [0, 0], sizes = [8, 32], strides = [1, 1]} : vector<8x64xf32> to vector<8x32xf32>
    %96 = vector.extract_strided_slice %94 {offsets = [0, 32], sizes = [8, 32], strides = [1, 1]} : vector<8x64xf32> to vector<8x32xf32>
    %97 = vector.extract_strided_slice %88 {offsets = [0, 64], sizes = [8, 32], strides = [1, 1]} : vector<8x96xf32> to vector<8x32xf32>
    %98 = math.tanh %97 : vector<8x32xf32>
    %99 = arith.mulf %95, %77 : vector<8x32xf32>
    %cst_31 = arith.constant 1.000000e+00 : f32
    %100 = vector.broadcast %cst_31 : f32 to vector<8x32xf32>
    %101 = arith.subf %100, %95 : vector<8x32xf32>
    %102 = arith.mulf %101, %98 : vector<8x32xf32>
    %103 = arith.addf %99, %102 : vector<8x32xf32>
    %104 = math.tanh %103 : vector<8x32xf32>
    %105 = arith.mulf %96, %104 : vector<8x32xf32>
    %106 = arith.index_cast %c3_i32 : i32 to index
    %c0_32 = arith.constant 0 : index
    %c0_33 = arith.constant 0 : index
    %107 = vector.load %arg11[%106, %c0_32, %c0_33] : memref<8x8x32xf32, #tpu.memory_space<vmem>>, vector<1x8x32xf32>
    %108 = vector.shape_cast %107 : vector<1x8x32xf32> to vector<8x32xf32>
    %109 = vector.shape_cast %105 : vector<8x32xf32> to vector<1x8x32xf32>
    tpu.vector_store %arg11[%106, %c0_32, %c0_33], %109 {strides = array<i32>} : memref<8x8x32xf32, #tpu.memory_space<vmem>>, vector<1x8x32xf32>,
    %c4_i32 = arith.constant 4 : i32
    %110 = arith.index_cast %c4_i32 : i32 to index
    %c0_34 = arith.constant 0 : index
    %c0_35 = arith.constant 0 : index
    %111 = vector.load %arg1[%110, %c0_34, %c0_35] : memref<8x8x96xf32, #tpu.memory_space<vmem>>, vector<1x8x96xf32>
    %112 = vector.shape_cast %111 : vector<1x8x96xf32> to vector<8x96xf32>
    %cst_36 = arith.constant dense<0.000000e+00> : vector<8x96xf32>
    %113 = tpu.matmul %105, %3, %cst_36 {dimension_numbers = #tpu.dot_dimension_numbers<[1], [0], [0], [1], [0, 0, 1, 1], [], []>} : vector<8x32xf32>, vector<32x96xf32>, vector<8x96xf32> -> vector<8x96xf32>
    %114 = arith.addf %112, %113 : vector<8x96xf32>
    %115 = vector.extract_strided_slice %114 {offsets = [0, 0], sizes = [8, 64], strides = [1, 1]} : vector<8x96xf32> to vector<8x64xf32>
    %116 = arith.negf %115 : vector<8x64xf32>
    %117 = math.exp %116 : vector<8x64xf32>
    %cst_37 = arith.constant 1.000000e+00 : f32
    %118 = vector.broadcast %cst_37 : f32 to vector<8x64xf32>
    %119 = arith.addf %118, %117 : vector<8x64xf32>
    %120 = arith.divf %118, %119 : vector<8x64xf32>
    %121 = vector.extract_strided_slice %120 {offsets = [0, 0], sizes = [8, 32], strides = [1, 1]} : vector<8x64xf32> to vector<8x32xf32>
    %122 = vector.extract_strided_slice %120 {offsets = [0, 32], sizes = [8, 32], strides = [1, 1]} : vector<8x64xf32> to vector<8x32xf32>
    %123 = vector.extract_strided_slice %114 {offsets = [0, 64], sizes = [8, 32], strides = [1, 1]} : vector<8x96xf32> to vector<8x32xf32>
    %124 = math.tanh %123 : vector<8x32xf32>
    %125 = arith.mulf %121, %103 : vector<8x32xf32>
    %cst_38 = arith.constant 1.000000e+00 : f32
    %126 = vector.broadcast %cst_38 : f32 to vector<8x32xf32>
    %127 = arith.subf %126, %121 : vector<8x32xf32>
    %128 = arith.mulf %127, %124 : vector<8x32xf32>
    %129 = arith.addf %125, %128 : vector<8x32xf32>
    %130 = math.tanh %129 : vector<8x32xf32>
    %131 = arith.mulf %122, %130 : vector<8x32xf32>
    %132 = arith.index_cast %c4_i32 : i32 to index
    %c0_39 = arith.constant 0 : index
    %c0_40 = arith.constant 0 : index
    %133 = vector.load %arg11[%132, %c0_39, %c0_40] : memref<8x8x32xf32, #tpu.memory_space<vmem>>, vector<1x8x32xf32>
    %134 = vector.shape_cast %133 : vector<1x8x32xf32> to vector<8x32xf32>
    %135 = vector.shape_cast %131 : vector<8x32xf32> to vector<1x8x32xf32>
    tpu.vector_store %arg11[%132, %c0_39, %c0_40], %135 {strides = array<i32>} : memref<8x8x32xf32, #tpu.memory_space<vmem>>, vector<1x8x32xf32>,
    %c5_i32 = arith.constant 5 : i32
    %136 = arith.index_cast %c5_i32 : i32 to index
    %c0_41 = arith.constant 0 : index
    %c0_42 = arith.constant 0 : index
    %137 = vector.load %arg1[%136, %c0_41, %c0_42] : memref<8x8x96xf32, #tpu.memory_space<vmem>>, vector<1x8x96xf32>
    %138 = vector.shape_cast %137 : vector<1x8x96xf32> to vector<8x96xf32>
    %cst_43 = arith.constant dense<0.000000e+00> : vector<8x96xf32>
    %139 = tpu.matmul %131, %3, %cst_43 {dimension_numbers = #tpu.dot_dimension_numbers<[1], [0], [0], [1], [0, 0, 1, 1], [], []>} : vector<8x32xf32>, vector<32x96xf32>, vector<8x96xf32> -> vector<8x96xf32>
    %140 = arith.addf %138, %139 : vector<8x96xf32>
    %141 = vector.extract_strided_slice %140 {offsets = [0, 0], sizes = [8, 64], strides = [1, 1]} : vector<8x96xf32> to vector<8x64xf32>
    %142 = arith.negf %141 : vector<8x64xf32>
    %143 = math.exp %142 : vector<8x64xf32>
    %cst_44 = arith.constant 1.000000e+00 : f32
    %144 = vector.broadcast %cst_44 : f32 to vector<8x64xf32>
    %145 = arith.addf %144, %143 : vector<8x64xf32>
    %146 = arith.divf %144, %145 : vector<8x64xf32>
    %147 = vector.extract_strided_slice %146 {offsets = [0, 0], sizes = [8, 32], strides = [1, 1]} : vector<8x64xf32> to vector<8x32xf32>
    %148 = vector.extract_strided_slice %146 {offsets = [0, 32], sizes = [8, 32], strides = [1, 1]} : vector<8x64xf32> to vector<8x32xf32>
    %149 = vector.extract_strided_slice %140 {offsets = [0, 64], sizes = [8, 32], strides = [1, 1]} : vector<8x96xf32> to vector<8x32xf32>
    %150 = math.tanh %149 : vector<8x32xf32>
    %151 = arith.mulf %147, %129 : vector<8x32xf32>
    %cst_45 = arith.constant 1.000000e+00 : f32
    %152 = vector.broadcast %cst_45 : f32 to vector<8x32xf32>
    %153 = arith.subf %152, %147 : vector<8x32xf32>
    %154 = arith.mulf %153, %150 : vector<8x32xf32>
    %155 = arith.addf %151, %154 : vector<8x32xf32>
    %156 = math.tanh %155 : vector<8x32xf32>
    %157 = arith.mulf %148, %156 : vector<8x32xf32>
    %158 = arith.index_cast %c5_i32 : i32 to index
    %c0_46 = arith.constant 0 : index
    %c0_47 = arith.constant 0 : index
    %159 = vector.load %arg11[%158, %c0_46, %c0_47] : memref<8x8x32xf32, #tpu.memory_space<vmem>>, vector<1x8x32xf32>
    %160 = vector.shape_cast %159 : vector<1x8x32xf32> to vector<8x32xf32>
    %161 = vector.shape_cast %157 : vector<8x32xf32> to vector<1x8x32xf32>
    tpu.vector_store %arg11[%158, %c0_46, %c0_47], %161 {strides = array<i32>} : memref<8x8x32xf32, #tpu.memory_space<vmem>>, vector<1x8x32xf32>,
    %c6_i32 = arith.constant 6 : i32
    %162 = arith.index_cast %c6_i32 : i32 to index
    %c0_48 = arith.constant 0 : index
    %c0_49 = arith.constant 0 : index
    %163 = vector.load %arg1[%162, %c0_48, %c0_49] : memref<8x8x96xf32, #tpu.memory_space<vmem>>, vector<1x8x96xf32>
    %164 = vector.shape_cast %163 : vector<1x8x96xf32> to vector<8x96xf32>
    %cst_50 = arith.constant dense<0.000000e+00> : vector<8x96xf32>
    %165 = tpu.matmul %157, %3, %cst_50 {dimension_numbers = #tpu.dot_dimension_numbers<[1], [0], [0], [1], [0, 0, 1, 1], [], []>} : vector<8x32xf32>, vector<32x96xf32>, vector<8x96xf32> -> vector<8x96xf32>
    %166 = arith.addf %164, %165 : vector<8x96xf32>
    %167 = vector.extract_strided_slice %166 {offsets = [0, 0], sizes = [8, 64], strides = [1, 1]} : vector<8x96xf32> to vector<8x64xf32>
    %168 = arith.negf %167 : vector<8x64xf32>
    %169 = math.exp %168 : vector<8x64xf32>
    %cst_51 = arith.constant 1.000000e+00 : f32
    %170 = vector.broadcast %cst_51 : f32 to vector<8x64xf32>
    %171 = arith.addf %170, %169 : vector<8x64xf32>
    %172 = arith.divf %170, %171 : vector<8x64xf32>
    %173 = vector.extract_strided_slice %172 {offsets = [0, 0], sizes = [8, 32], strides = [1, 1]} : vector<8x64xf32> to vector<8x32xf32>
    %174 = vector.extract_strided_slice %172 {offsets = [0, 32], sizes = [8, 32], strides = [1, 1]} : vector<8x64xf32> to vector<8x32xf32>
    %175 = vector.extract_strided_slice %166 {offsets = [0, 64], sizes = [8, 32], strides = [1, 1]} : vector<8x96xf32> to vector<8x32xf32>
    %176 = math.tanh %175 : vector<8x32xf32>
    %177 = arith.mulf %173, %155 : vector<8x32xf32>
    %cst_52 = arith.constant 1.000000e+00 : f32
    %178 = vector.broadcast %cst_52 : f32 to vector<8x32xf32>
    %179 = arith.subf %178, %173 : vector<8x32xf32>
    %180 = arith.mulf %179, %176 : vector<8x32xf32>
    %181 = arith.addf %177, %180 : vector<8x32xf32>
    %182 = math.tanh %181 : vector<8x32xf32>
    %183 = arith.mulf %174, %182 : vector<8x32xf32>
    %184 = arith.index_cast %c6_i32 : i32 to index
    %c0_53 = arith.constant 0 : index
    %c0_54 = arith.constant 0 : index
    %185 = vector.load %arg11[%184, %c0_53, %c0_54] : memref<8x8x32xf32, #tpu.memory_space<vmem>>, vector<1x8x32xf32>
    %186 = vector.shape_cast %185 : vector<1x8x32xf32> to vector<8x32xf32>
    %187 = vector.shape_cast %183 : vector<8x32xf32> to vector<1x8x32xf32>
    tpu.vector_store %arg11[%184, %c0_53, %c0_54], %187 {strides = array<i32>} : memref<8x8x32xf32, #tpu.memory_space<vmem>>, vector<1x8x32xf32>,
    %c7_i32 = arith.constant 7 : i32
    %188 = arith.index_cast %c7_i32 : i32 to index
    %c0_55 = arith.constant 0 : index
    %c0_56 = arith.constant 0 : index
    %189 = vector.load %arg1[%188, %c0_55, %c0_56] : memref<8x8x96xf32, #tpu.memory_space<vmem>>, vector<1x8x96xf32>
    %190 = vector.shape_cast %189 : vector<1x8x96xf32> to vector<8x96xf32>
    %cst_57 = arith.constant dense<0.000000e+00> : vector<8x96xf32>
    %191 = tpu.matmul %183, %3, %cst_57 {dimension_numbers = #tpu.dot_dimension_numbers<[1], [0], [0], [1], [0, 0, 1, 1], [], []>} : vector<8x32xf32>, vector<32x96xf32>, vector<8x96xf32> -> vector<8x96xf32>
    %192 = arith.addf %190, %191 : vector<8x96xf32>
    %193 = vector.extract_strided_slice %192 {offsets = [0, 0], sizes = [8, 64], strides = [1, 1]} : vector<8x96xf32> to vector<8x64xf32>
    %194 = arith.negf %193 : vector<8x64xf32>
    %195 = math.exp %194 : vector<8x64xf32>
    %cst_58 = arith.constant 1.000000e+00 : f32
    %196 = vector.broadcast %cst_58 : f32 to vector<8x64xf32>
    %197 = arith.addf %196, %195 : vector<8x64xf32>
    %198 = arith.divf %196, %197 : vector<8x64xf32>
    %199 = vector.extract_strided_slice %198 {offsets = [0, 0], sizes = [8, 32], strides = [1, 1]} : vector<8x64xf32> to vector<8x32xf32>
    %200 = vector.extract_strided_slice %198 {offsets = [0, 32], sizes = [8, 32], strides = [1, 1]} : vector<8x64xf32> to vector<8x32xf32>
    %201 = vector.extract_strided_slice %192 {offsets = [0, 64], sizes = [8, 32], strides = [1, 1]} : vector<8x96xf32> to vector<8x32xf32>
    %202 = math.tanh %201 : vector<8x32xf32>
    %203 = arith.mulf %199, %181 : vector<8x32xf32>
    %cst_59 = arith.constant 1.000000e+00 : f32
    %204 = vector.broadcast %cst_59 : f32 to vector<8x32xf32>
    %205 = arith.subf %204, %199 : vector<8x32xf32>
    %206 = arith.mulf %205, %202 : vector<8x32xf32>
    %207 = arith.addf %203, %206 : vector<8x32xf32>
    %208 = math.tanh %207 : vector<8x32xf32>
    %209 = arith.mulf %200, %208 : vector<8x32xf32>
    %210 = arith.index_cast %c7_i32 : i32 to index
    %c0_60 = arith.constant 0 : index
    %c0_61 = arith.constant 0 : index
    %211 = vector.load %arg11[%210, %c0_60, %c0_61] : memref<8x8x32xf32, #tpu.memory_space<vmem>>, vector<1x8x32xf32>
    %212 = vector.shape_cast %211 : vector<1x8x32xf32> to vector<8x32xf32>
    %213 = vector.shape_cast %209 : vector<8x32xf32> to vector<1x8x32xf32>
    tpu.vector_store %arg11[%210, %c0_60, %c0_61], %213 {strides = array<i32>} : memref<8x8x32xf32, #tpu.memory_space<vmem>>, vector<1x8x32xf32>,
    %c8_i32 = arith.constant 8 : i32
    %c0_62 = arith.constant 0 : index
    %c0_63 = arith.constant 0 : index
    %214 = vector.load %arg7[%c0_62, %c0_63] : memref<8x32xf32, #tpu.memory_space<vmem>>, vector<8x32xf32>
    tpu.vector_store %arg7[%c0_62, %c0_63], %209 {strides = array<i32>} : memref<8x32xf32, #tpu.memory_space<vmem>>, vector<8x32xf32>,
    %c0_64 = arith.constant 0 : index
    %c0_65 = arith.constant 0 : index
    %215 = vector.load %arg8[%c0_64, %c0_65] : memref<8x32xf32, #tpu.memory_space<vmem>>, vector<8x32xf32>
    tpu.vector_store %arg8[%c0_64, %c0_65], %207 {strides = array<i32>} : memref<8x32xf32, #tpu.memory_space<vmem>>, vector<8x32xf32>,
    %c0_66 = arith.constant 0 : index
    %c0_67 = arith.constant 0 : index
    %216 = vector.load %arg4[%c0_66, %c0_67] : memref<32x96xf32, #tpu.memory_space<vmem>>, vector<32x96xf32>
    %c0_68 = arith.constant 0 : index
    %c0_69 = arith.constant 0 : index
    %217 = vector.load %arg3[%c0_68, %c0_69] : memref<32x96xf32, #tpu.memory_space<vmem>>, vector<32x96xf32>
    %c0_70 = arith.constant 0 : index
    %c0_71 = arith.constant 0 : index
    %218 = vector.load %arg5[%c0_70, %c0_71] : memref<1x96xf32, #tpu.memory_space<vmem>>, vector<1x96xf32>
    %219 = vector.shape_cast %218 : vector<1x96xf32> to vector<1x96xf32>
    %220 = vector.broadcast %219 : vector<1x96xf32> to vector<8x96xf32>
    %c0_72 = arith.constant 0 : index
    %c0_73 = arith.constant 0 : index
    %221 = vector.load %arg9[%c0_72, %c0_73] : memref<8x32xf32, #tpu.memory_space<vmem>>, vector<8x32xf32>
    %c0_74 = arith.constant 0 : index
    %c0_75 = arith.constant 0 : index
    %222 = vector.load %arg10[%c0_74, %c0_75] : memref<8x32xf32, #tpu.memory_space<vmem>>, vector<8x32xf32>
    %c0_i32_76 = arith.constant 0 : i32
    %223 = arith.index_cast %c0_i32_76 : i32 to index
    %c0_77 = arith.constant 0 : index
    %c0_78 = arith.constant 0 : index
    %224 = vector.load %arg11[%223, %c0_77, %c0_78] : memref<8x8x32xf32, #tpu.memory_space<vmem>>, vector<1x8x32xf32>
    %225 = vector.shape_cast %224 : vector<1x8x32xf32> to vector<8x32xf32>
    %cst_79 = arith.constant dense<0.000000e+00> : vector<8x96xf32>
    %226 = tpu.matmul %225, %217, %cst_79 {dimension_numbers = #tpu.dot_dimension_numbers<[1], [0], [0], [1], [0, 0, 1, 1], [], []>} : vector<8x32xf32>, vector<32x96xf32>, vector<8x96xf32> -> vector<8x96xf32>
    %cst_80 = arith.constant dense<0.000000e+00> : vector<8x96xf32>
    %227 = tpu.matmul %221, %216, %cst_80 {dimension_numbers = #tpu.dot_dimension_numbers<[1], [0], [0], [1], [0, 0, 1, 1], [], []>} : vector<8x32xf32>, vector<32x96xf32>, vector<8x96xf32> -> vector<8x96xf32>
    %228 = arith.addf %226, %227 : vector<8x96xf32>
    %229 = arith.addf %228, %220 : vector<8x96xf32>
    %230 = vector.extract_strided_slice %229 {offsets = [0, 0], sizes = [8, 64], strides = [1, 1]} : vector<8x96xf32> to vector<8x64xf32>
    %231 = arith.negf %230 : vector<8x64xf32>
    %232 = math.exp %231 : vector<8x64xf32>
    %cst_81 = arith.constant 1.000000e+00 : f32
    %233 = vector.broadcast %cst_81 : f32 to vector<8x64xf32>
    %234 = arith.addf %233, %232 : vector<8x64xf32>
    %235 = arith.divf %233, %234 : vector<8x64xf32>
    %236 = vector.extract_strided_slice %235 {offsets = [0, 0], sizes = [8, 32], strides = [1, 1]} : vector<8x64xf32> to vector<8x32xf32>
    %237 = vector.extract_strided_slice %235 {offsets = [0, 32], sizes = [8, 32], strides = [1, 1]} : vector<8x64xf32> to vector<8x32xf32>
    %238 = vector.extract_strided_slice %229 {offsets = [0, 64], sizes = [8, 32], strides = [1, 1]} : vector<8x96xf32> to vector<8x32xf32>
    %239 = math.tanh %238 : vector<8x32xf32>
    %240 = arith.mulf %236, %222 : vector<8x32xf32>
    %cst_82 = arith.constant 1.000000e+00 : f32
    %241 = vector.broadcast %cst_82 : f32 to vector<8x32xf32>
    %242 = arith.subf %241, %236 : vector<8x32xf32>
    %243 = arith.mulf %242, %239 : vector<8x32xf32>
    %244 = arith.addf %240, %243 : vector<8x32xf32>
    %245 = math.tanh %244 : vector<8x32xf32>
    %246 = arith.mulf %237, %245 : vector<8x32xf32>
    %247 = arith.index_cast %c0_i32_76 : i32 to index
    %c0_83 = arith.constant 0 : index
    %c0_84 = arith.constant 0 : index
    %248 = vector.load %arg6[%247, %c0_83, %c0_84] : memref<8x8x32xf32, #tpu.memory_space<vmem>>, vector<1x8x32xf32>
    %249 = vector.shape_cast %248 : vector<1x8x32xf32> to vector<8x32xf32>
    %250 = vector.shape_cast %246 : vector<8x32xf32> to vector<1x8x32xf32>
    tpu.vector_store %arg6[%247, %c0_83, %c0_84], %250 {strides = array<i32>} : memref<8x8x32xf32, #tpu.memory_space<vmem>>, vector<1x8x32xf32>,
    %c1_i32_85 = arith.constant 1 : i32
    %251 = arith.index_cast %c1_i32_85 : i32 to index
    %c0_86 = arith.constant 0 : index
    %c0_87 = arith.constant 0 : index
    %252 = vector.load %arg11[%251, %c0_86, %c0_87] : memref<8x8x32xf32, #tpu.memory_space<vmem>>, vector<1x8x32xf32>
    %253 = vector.shape_cast %252 : vector<1x8x32xf32> to vector<8x32xf32>
    %cst_88 = arith.constant dense<0.000000e+00> : vector<8x96xf32>
    %254 = tpu.matmul %253, %217, %cst_88 {dimension_numbers = #tpu.dot_dimension_numbers<[1], [0], [0], [1], [0, 0, 1, 1], [], []>} : vector<8x32xf32>, vector<32x96xf32>, vector<8x96xf32> -> vector<8x96xf32>
    %cst_89 = arith.constant dense<0.000000e+00> : vector<8x96xf32>
    %255 = tpu.matmul %246, %216, %cst_89 {dimension_numbers = #tpu.dot_dimension_numbers<[1], [0], [0], [1], [0, 0, 1, 1], [], []>} : vector<8x32xf32>, vector<32x96xf32>, vector<8x96xf32> -> vector<8x96xf32>
    %256 = arith.addf %254, %255 : vector<8x96xf32>
    %257 = arith.addf %256, %220 : vector<8x96xf32>
    %258 = vector.extract_strided_slice %257 {offsets = [0, 0], sizes = [8, 64], strides = [1, 1]} : vector<8x96xf32> to vector<8x64xf32>
    %259 = arith.negf %258 : vector<8x64xf32>
    %260 = math.exp %259 : vector<8x64xf32>
    %cst_90 = arith.constant 1.000000e+00 : f32
    %261 = vector.broadcast %cst_90 : f32 to vector<8x64xf32>
    %262 = arith.addf %261, %260 : vector<8x64xf32>
    %263 = arith.divf %261, %262 : vector<8x64xf32>
    %264 = vector.extract_strided_slice %263 {offsets = [0, 0], sizes = [8, 32], strides = [1, 1]} : vector<8x64xf32> to vector<8x32xf32>
    %265 = vector.extract_strided_slice %263 {offsets = [0, 32], sizes = [8, 32], strides = [1, 1]} : vector<8x64xf32> to vector<8x32xf32>
    %266 = vector.extract_strided_slice %257 {offsets = [0, 64], sizes = [8, 32], strides = [1, 1]} : vector<8x96xf32> to vector<8x32xf32>
    %267 = math.tanh %266 : vector<8x32xf32>
    %268 = arith.mulf %264, %244 : vector<8x32xf32>
    %cst_91 = arith.constant 1.000000e+00 : f32
    %269 = vector.broadcast %cst_91 : f32 to vector<8x32xf32>
    %270 = arith.subf %269, %264 : vector<8x32xf32>
    %271 = arith.mulf %270, %267 : vector<8x32xf32>
    %272 = arith.addf %268, %271 : vector<8x32xf32>
    %273 = math.tanh %272 : vector<8x32xf32>
    %274 = arith.mulf %265, %273 : vector<8x32xf32>
    %275 = arith.index_cast %c1_i32_85 : i32 to index
    %c0_92 = arith.constant 0 : index
    %c0_93 = arith.constant 0 : index
    %276 = vector.load %arg6[%275, %c0_92, %c0_93] : memref<8x8x32xf32, #tpu.memory_space<vmem>>, vector<1x8x32xf32>
    %277 = vector.shape_cast %276 : vector<1x8x32xf32> to vector<8x32xf32>
    %278 = vector.shape_cast %274 : vector<8x32xf32> to vector<1x8x32xf32>
    tpu.vector_store %arg6[%275, %c0_92, %c0_93], %278 {strides = array<i32>} : memref<8x8x32xf32, #tpu.memory_space<vmem>>, vector<1x8x32xf32>,
    %c2_i32_94 = arith.constant 2 : i32
    %279 = arith.index_cast %c2_i32_94 : i32 to index
    %c0_95 = arith.constant 0 : index
    %c0_96 = arith.constant 0 : index
    %280 = vector.load %arg11[%279, %c0_95, %c0_96] : memref<8x8x32xf32, #tpu.memory_space<vmem>>, vector<1x8x32xf32>
    %281 = vector.shape_cast %280 : vector<1x8x32xf32> to vector<8x32xf32>
    %cst_97 = arith.constant dense<0.000000e+00> : vector<8x96xf32>
    %282 = tpu.matmul %281, %217, %cst_97 {dimension_numbers = #tpu.dot_dimension_numbers<[1], [0], [0], [1], [0, 0, 1, 1], [], []>} : vector<8x32xf32>, vector<32x96xf32>, vector<8x96xf32> -> vector<8x96xf32>
    %cst_98 = arith.constant dense<0.000000e+00> : vector<8x96xf32>
    %283 = tpu.matmul %274, %216, %cst_98 {dimension_numbers = #tpu.dot_dimension_numbers<[1], [0], [0], [1], [0, 0, 1, 1], [], []>} : vector<8x32xf32>, vector<32x96xf32>, vector<8x96xf32> -> vector<8x96xf32>
    %284 = arith.addf %282, %283 : vector<8x96xf32>
    %285 = arith.addf %284, %220 : vector<8x96xf32>
    %286 = vector.extract_strided_slice %285 {offsets = [0, 0], sizes = [8, 64], strides = [1, 1]} : vector<8x96xf32> to vector<8x64xf32>
    %287 = arith.negf %286 : vector<8x64xf32>
    %288 = math.exp %287 : vector<8x64xf32>
    %cst_99 = arith.constant 1.000000e+00 : f32
    %289 = vector.broadcast %cst_99 : f32 to vector<8x64xf32>
    %290 = arith.addf %289, %288 : vector<8x64xf32>
    %291 = arith.divf %289, %290 : vector<8x64xf32>
    %292 = vector.extract_strided_slice %291 {offsets = [0, 0], sizes = [8, 32], strides = [1, 1]} : vector<8x64xf32> to vector<8x32xf32>
    %293 = vector.extract_strided_slice %291 {offsets = [0, 32], sizes = [8, 32], strides = [1, 1]} : vector<8x64xf32> to vector<8x32xf32>
    %294 = vector.extract_strided_slice %285 {offsets = [0, 64], sizes = [8, 32], strides = [1, 1]} : vector<8x96xf32> to vector<8x32xf32>
    %295 = math.tanh %294 : vector<8x32xf32>
    %296 = arith.mulf %292, %272 : vector<8x32xf32>
    %cst_100 = arith.constant 1.000000e+00 : f32
    %297 = vector.broadcast %cst_100 : f32 to vector<8x32xf32>
    %298 = arith.subf %297, %292 : vector<8x32xf32>
    %299 = arith.mulf %298, %295 : vector<8x32xf32>
    %300 = arith.addf %296, %299 : vector<8x32xf32>
    %301 = math.tanh %300 : vector<8x32xf32>
    %302 = arith.mulf %293, %301 : vector<8x32xf32>
    %303 = arith.index_cast %c2_i32_94 : i32 to index
    %c0_101 = arith.constant 0 : index
    %c0_102 = arith.constant 0 : index
    %304 = vector.load %arg6[%303, %c0_101, %c0_102] : memref<8x8x32xf32, #tpu.memory_space<vmem>>, vector<1x8x32xf32>
    %305 = vector.shape_cast %304 : vector<1x8x32xf32> to vector<8x32xf32>
    %306 = vector.shape_cast %302 : vector<8x32xf32> to vector<1x8x32xf32>
    tpu.vector_store %arg6[%303, %c0_101, %c0_102], %306 {strides = array<i32>} : memref<8x8x32xf32, #tpu.memory_space<vmem>>, vector<1x8x32xf32>,
    %c3_i32_103 = arith.constant 3 : i32
    %307 = arith.index_cast %c3_i32_103 : i32 to index
    %c0_104 = arith.constant 0 : index
    %c0_105 = arith.constant 0 : index
    %308 = vector.load %arg11[%307, %c0_104, %c0_105] : memref<8x8x32xf32, #tpu.memory_space<vmem>>, vector<1x8x32xf32>
    %309 = vector.shape_cast %308 : vector<1x8x32xf32> to vector<8x32xf32>
    %cst_106 = arith.constant dense<0.000000e+00> : vector<8x96xf32>
    %310 = tpu.matmul %309, %217, %cst_106 {dimension_numbers = #tpu.dot_dimension_numbers<[1], [0], [0], [1], [0, 0, 1, 1], [], []>} : vector<8x32xf32>, vector<32x96xf32>, vector<8x96xf32> -> vector<8x96xf32>
    %cst_107 = arith.constant dense<0.000000e+00> : vector<8x96xf32>
    %311 = tpu.matmul %302, %216, %cst_107 {dimension_numbers = #tpu.dot_dimension_numbers<[1], [0], [0], [1], [0, 0, 1, 1], [], []>} : vector<8x32xf32>, vector<32x96xf32>, vector<8x96xf32> -> vector<8x96xf32>
    %312 = arith.addf %310, %311 : vector<8x96xf32>
    %313 = arith.addf %312, %220 : vector<8x96xf32>
    %314 = vector.extract_strided_slice %313 {offsets = [0, 0], sizes = [8, 64], strides = [1, 1]} : vector<8x96xf32> to vector<8x64xf32>
    %315 = arith.negf %314 : vector<8x64xf32>
    %316 = math.exp %315 : vector<8x64xf32>
    %cst_108 = arith.constant 1.000000e+00 : f32
    %317 = vector.broadcast %cst_108 : f32 to vector<8x64xf32>
    %318 = arith.addf %317, %316 : vector<8x64xf32>
    %319 = arith.divf %317, %318 : vector<8x64xf32>
    %320 = vector.extract_strided_slice %319 {offsets = [0, 0], sizes = [8, 32], strides = [1, 1]} : vector<8x64xf32> to vector<8x32xf32>
    %321 = vector.extract_strided_slice %319 {offsets = [0, 32], sizes = [8, 32], strides = [1, 1]} : vector<8x64xf32> to vector<8x32xf32>
    %322 = vector.extract_strided_slice %313 {offsets = [0, 64], sizes = [8, 32], strides = [1, 1]} : vector<8x96xf32> to vector<8x32xf32>
    %323 = math.tanh %322 : vector<8x32xf32>
    %324 = arith.mulf %320, %300 : vector<8x32xf32>
    %cst_109 = arith.constant 1.000000e+00 : f32
    %325 = vector.broadcast %cst_109 : f32 to vector<8x32xf32>
    %326 = arith.subf %325, %320 : vector<8x32xf32>
    %327 = arith.mulf %326, %323 : vector<8x32xf32>
    %328 = arith.addf %324, %327 : vector<8x32xf32>
    %329 = math.tanh %328 : vector<8x32xf32>
    %330 = arith.mulf %321, %329 : vector<8x32xf32>
    %331 = arith.index_cast %c3_i32_103 : i32 to index
    %c0_110 = arith.constant 0 : index
    %c0_111 = arith.constant 0 : index
    %332 = vector.load %arg6[%331, %c0_110, %c0_111] : memref<8x8x32xf32, #tpu.memory_space<vmem>>, vector<1x8x32xf32>
    %333 = vector.shape_cast %332 : vector<1x8x32xf32> to vector<8x32xf32>
    %334 = vector.shape_cast %330 : vector<8x32xf32> to vector<1x8x32xf32>
    tpu.vector_store %arg6[%331, %c0_110, %c0_111], %334 {strides = array<i32>} : memref<8x8x32xf32, #tpu.memory_space<vmem>>, vector<1x8x32xf32>,
    %c4_i32_112 = arith.constant 4 : i32
    %335 = arith.index_cast %c4_i32_112 : i32 to index
    %c0_113 = arith.constant 0 : index
    %c0_114 = arith.constant 0 : index
    %336 = vector.load %arg11[%335, %c0_113, %c0_114] : memref<8x8x32xf32, #tpu.memory_space<vmem>>, vector<1x8x32xf32>
    %337 = vector.shape_cast %336 : vector<1x8x32xf32> to vector<8x32xf32>
    %cst_115 = arith.constant dense<0.000000e+00> : vector<8x96xf32>
    %338 = tpu.matmul %337, %217, %cst_115 {dimension_numbers = #tpu.dot_dimension_numbers<[1], [0], [0], [1], [0, 0, 1, 1], [], []>} : vector<8x32xf32>, vector<32x96xf32>, vector<8x96xf32> -> vector<8x96xf32>
    %cst_116 = arith.constant dense<0.000000e+00> : vector<8x96xf32>
    %339 = tpu.matmul %330, %216, %cst_116 {dimension_numbers = #tpu.dot_dimension_numbers<[1], [0], [0], [1], [0, 0, 1, 1], [], []>} : vector<8x32xf32>, vector<32x96xf32>, vector<8x96xf32> -> vector<8x96xf32>
    %340 = arith.addf %338, %339 : vector<8x96xf32>
    %341 = arith.addf %340, %220 : vector<8x96xf32>
    %342 = vector.extract_strided_slice %341 {offsets = [0, 0], sizes = [8, 64], strides = [1, 1]} : vector<8x96xf32> to vector<8x64xf32>
    %343 = arith.negf %342 : vector<8x64xf32>
    %344 = math.exp %343 : vector<8x64xf32>
    %cst_117 = arith.constant 1.000000e+00 : f32
    %345 = vector.broadcast %cst_117 : f32 to vector<8x64xf32>
    %346 = arith.addf %345, %344 : vector<8x64xf32>
    %347 = arith.divf %345, %346 : vector<8x64xf32>
    %348 = vector.extract_strided_slice %347 {offsets = [0, 0], sizes = [8, 32], strides = [1, 1]} : vector<8x64xf32> to vector<8x32xf32>
    %349 = vector.extract_strided_slice %347 {offsets = [0, 32], sizes = [8, 32], strides = [1, 1]} : vector<8x64xf32> to vector<8x32xf32>
    %350 = vector.extract_strided_slice %341 {offsets = [0, 64], sizes = [8, 32], strides = [1, 1]} : vector<8x96xf32> to vector<8x32xf32>
    %351 = math.tanh %350 : vector<8x32xf32>
    %352 = arith.mulf %348, %328 : vector<8x32xf32>
    %cst_118 = arith.constant 1.000000e+00 : f32
    %353 = vector.broadcast %cst_118 : f32 to vector<8x32xf32>
    %354 = arith.subf %353, %348 : vector<8x32xf32>
    %355 = arith.mulf %354, %351 : vector<8x32xf32>
    %356 = arith.addf %352, %355 : vector<8x32xf32>
    %357 = math.tanh %356 : vector<8x32xf32>
    %358 = arith.mulf %349, %357 : vector<8x32xf32>
    %359 = arith.index_cast %c4_i32_112 : i32 to index
    %c0_119 = arith.constant 0 : index
    %c0_120 = arith.constant 0 : index
    %360 = vector.load %arg6[%359, %c0_119, %c0_120] : memref<8x8x32xf32, #tpu.memory_space<vmem>>, vector<1x8x32xf32>
    %361 = vector.shape_cast %360 : vector<1x8x32xf32> to vector<8x32xf32>
    %362 = vector.shape_cast %358 : vector<8x32xf32> to vector<1x8x32xf32>
    tpu.vector_store %arg6[%359, %c0_119, %c0_120], %362 {strides = array<i32>} : memref<8x8x32xf32, #tpu.memory_space<vmem>>, vector<1x8x32xf32>,
    %c5_i32_121 = arith.constant 5 : i32
    %363 = arith.index_cast %c5_i32_121 : i32 to index
    %c0_122 = arith.constant 0 : index
    %c0_123 = arith.constant 0 : index
    %364 = vector.load %arg11[%363, %c0_122, %c0_123] : memref<8x8x32xf32, #tpu.memory_space<vmem>>, vector<1x8x32xf32>
    %365 = vector.shape_cast %364 : vector<1x8x32xf32> to vector<8x32xf32>
    %cst_124 = arith.constant dense<0.000000e+00> : vector<8x96xf32>
    %366 = tpu.matmul %365, %217, %cst_124 {dimension_numbers = #tpu.dot_dimension_numbers<[1], [0], [0], [1], [0, 0, 1, 1], [], []>} : vector<8x32xf32>, vector<32x96xf32>, vector<8x96xf32> -> vector<8x96xf32>
    %cst_125 = arith.constant dense<0.000000e+00> : vector<8x96xf32>
    %367 = tpu.matmul %358, %216, %cst_125 {dimension_numbers = #tpu.dot_dimension_numbers<[1], [0], [0], [1], [0, 0, 1, 1], [], []>} : vector<8x32xf32>, vector<32x96xf32>, vector<8x96xf32> -> vector<8x96xf32>
    %368 = arith.addf %366, %367 : vector<8x96xf32>
    %369 = arith.addf %368, %220 : vector<8x96xf32>
    %370 = vector.extract_strided_slice %369 {offsets = [0, 0], sizes = [8, 64], strides = [1, 1]} : vector<8x96xf32> to vector<8x64xf32>
    %371 = arith.negf %370 : vector<8x64xf32>
    %372 = math.exp %371 : vector<8x64xf32>
    %cst_126 = arith.constant 1.000000e+00 : f32
    %373 = vector.broadcast %cst_126 : f32 to vector<8x64xf32>
    %374 = arith.addf %373, %372 : vector<8x64xf32>
    %375 = arith.divf %373, %374 : vector<8x64xf32>
    %376 = vector.extract_strided_slice %375 {offsets = [0, 0], sizes = [8, 32], strides = [1, 1]} : vector<8x64xf32> to vector<8x32xf32>
    %377 = vector.extract_strided_slice %375 {offsets = [0, 32], sizes = [8, 32], strides = [1, 1]} : vector<8x64xf32> to vector<8x32xf32>
    %378 = vector.extract_strided_slice %369 {offsets = [0, 64], sizes = [8, 32], strides = [1, 1]} : vector<8x96xf32> to vector<8x32xf32>
    %379 = math.tanh %378 : vector<8x32xf32>
    %380 = arith.mulf %376, %356 : vector<8x32xf32>
    %cst_127 = arith.constant 1.000000e+00 : f32
    %381 = vector.broadcast %cst_127 : f32 to vector<8x32xf32>
    %382 = arith.subf %381, %376 : vector<8x32xf32>
    %383 = arith.mulf %382, %379 : vector<8x32xf32>
    %384 = arith.addf %380, %383 : vector<8x32xf32>
    %385 = math.tanh %384 : vector<8x32xf32>
    %386 = arith.mulf %377, %385 : vector<8x32xf32>
    %387 = arith.index_cast %c5_i32_121 : i32 to index
    %c0_128 = arith.constant 0 : index
    %c0_129 = arith.constant 0 : index
    %388 = vector.load %arg6[%387, %c0_128, %c0_129] : memref<8x8x32xf32, #tpu.memory_space<vmem>>, vector<1x8x32xf32>
    %389 = vector.shape_cast %388 : vector<1x8x32xf32> to vector<8x32xf32>
    %390 = vector.shape_cast %386 : vector<8x32xf32> to vector<1x8x32xf32>
    tpu.vector_store %arg6[%387, %c0_128, %c0_129], %390 {strides = array<i32>} : memref<8x8x32xf32, #tpu.memory_space<vmem>>, vector<1x8x32xf32>,
    %c6_i32_130 = arith.constant 6 : i32
    %391 = arith.index_cast %c6_i32_130 : i32 to index
    %c0_131 = arith.constant 0 : index
    %c0_132 = arith.constant 0 : index
    %392 = vector.load %arg11[%391, %c0_131, %c0_132] : memref<8x8x32xf32, #tpu.memory_space<vmem>>, vector<1x8x32xf32>
    %393 = vector.shape_cast %392 : vector<1x8x32xf32> to vector<8x32xf32>
    %cst_133 = arith.constant dense<0.000000e+00> : vector<8x96xf32>
    %394 = tpu.matmul %393, %217, %cst_133 {dimension_numbers = #tpu.dot_dimension_numbers<[1], [0], [0], [1], [0, 0, 1, 1], [], []>} : vector<8x32xf32>, vector<32x96xf32>, vector<8x96xf32> -> vector<8x96xf32>
    %cst_134 = arith.constant dense<0.000000e+00> : vector<8x96xf32>
    %395 = tpu.matmul %386, %216, %cst_134 {dimension_numbers = #tpu.dot_dimension_numbers<[1], [0], [0], [1], [0, 0, 1, 1], [], []>} : vector<8x32xf32>, vector<32x96xf32>, vector<8x96xf32> -> vector<8x96xf32>
    %396 = arith.addf %394, %395 : vector<8x96xf32>
    %397 = arith.addf %396, %220 : vector<8x96xf32>
    %398 = vector.extract_strided_slice %397 {offsets = [0, 0], sizes = [8, 64], strides = [1, 1]} : vector<8x96xf32> to vector<8x64xf32>
    %399 = arith.negf %398 : vector<8x64xf32>
    %400 = math.exp %399 : vector<8x64xf32>
    %cst_135 = arith.constant 1.000000e+00 : f32
    %401 = vector.broadcast %cst_135 : f32 to vector<8x64xf32>
    %402 = arith.addf %401, %400 : vector<8x64xf32>
    %403 = arith.divf %401, %402 : vector<8x64xf32>
    %404 = vector.extract_strided_slice %403 {offsets = [0, 0], sizes = [8, 32], strides = [1, 1]} : vector<8x64xf32> to vector<8x32xf32>
    %405 = vector.extract_strided_slice %403 {offsets = [0, 32], sizes = [8, 32], strides = [1, 1]} : vector<8x64xf32> to vector<8x32xf32>
    %406 = vector.extract_strided_slice %397 {offsets = [0, 64], sizes = [8, 32], strides = [1, 1]} : vector<8x96xf32> to vector<8x32xf32>
    %407 = math.tanh %406 : vector<8x32xf32>
    %408 = arith.mulf %404, %384 : vector<8x32xf32>
    %cst_136 = arith.constant 1.000000e+00 : f32
    %409 = vector.broadcast %cst_136 : f32 to vector<8x32xf32>
    %410 = arith.subf %409, %404 : vector<8x32xf32>
    %411 = arith.mulf %410, %407 : vector<8x32xf32>
    %412 = arith.addf %408, %411 : vector<8x32xf32>
    %413 = math.tanh %412 : vector<8x32xf32>
    %414 = arith.mulf %405, %413 : vector<8x32xf32>
    %415 = arith.index_cast %c6_i32_130 : i32 to index
    %c0_137 = arith.constant 0 : index
    %c0_138 = arith.constant 0 : index
    %416 = vector.load %arg6[%415, %c0_137, %c0_138] : memref<8x8x32xf32, #tpu.memory_space<vmem>>, vector<1x8x32xf32>
    %417 = vector.shape_cast %416 : vector<1x8x32xf32> to vector<8x32xf32>
    %418 = vector.shape_cast %414 : vector<8x32xf32> to vector<1x8x32xf32>
    tpu.vector_store %arg6[%415, %c0_137, %c0_138], %418 {strides = array<i32>} : memref<8x8x32xf32, #tpu.memory_space<vmem>>, vector<1x8x32xf32>,
    %c7_i32_139 = arith.constant 7 : i32
    %419 = arith.index_cast %c7_i32_139 : i32 to index
    %c0_140 = arith.constant 0 : index
    %c0_141 = arith.constant 0 : index
    %420 = vector.load %arg11[%419, %c0_140, %c0_141] : memref<8x8x32xf32, #tpu.memory_space<vmem>>, vector<1x8x32xf32>
    %421 = vector.shape_cast %420 : vector<1x8x32xf32> to vector<8x32xf32>
    %cst_142 = arith.constant dense<0.000000e+00> : vector<8x96xf32>
    %422 = tpu.matmul %421, %217, %cst_142 {dimension_numbers = #tpu.dot_dimension_numbers<[1], [0], [0], [1], [0, 0, 1, 1], [], []>} : vector<8x32xf32>, vector<32x96xf32>, vector<8x96xf32> -> vector<8x96xf32>
    %cst_143 = arith.constant dense<0.000000e+00> : vector<8x96xf32>
    %423 = tpu.matmul %414, %216, %cst_143 {dimension_numbers = #tpu.dot_dimension_numbers<[1], [0], [0], [1], [0, 0, 1, 1], [], []>} : vector<8x32xf32>, vector<32x96xf32>, vector<8x96xf32> -> vector<8x96xf32>
    %424 = arith.addf %422, %423 : vector<8x96xf32>
    %425 = arith.addf %424, %220 : vector<8x96xf32>
    %426 = vector.extract_strided_slice %425 {offsets = [0, 0], sizes = [8, 64], strides = [1, 1]} : vector<8x96xf32> to vector<8x64xf32>
    %427 = arith.negf %426 : vector<8x64xf32>
    %428 = math.exp %427 : vector<8x64xf32>
    %cst_144 = arith.constant 1.000000e+00 : f32
    %429 = vector.broadcast %cst_144 : f32 to vector<8x64xf32>
    %430 = arith.addf %429, %428 : vector<8x64xf32>
    %431 = arith.divf %429, %430 : vector<8x64xf32>
    %432 = vector.extract_strided_slice %431 {offsets = [0, 0], sizes = [8, 32], strides = [1, 1]} : vector<8x64xf32> to vector<8x32xf32>
    %433 = vector.extract_strided_slice %431 {offsets = [0, 32], sizes = [8, 32], strides = [1, 1]} : vector<8x64xf32> to vector<8x32xf32>
    %434 = vector.extract_strided_slice %425 {offsets = [0, 64], sizes = [8, 32], strides = [1, 1]} : vector<8x96xf32> to vector<8x32xf32>
    %435 = math.tanh %434 : vector<8x32xf32>
    %436 = arith.mulf %432, %412 : vector<8x32xf32>
    %cst_145 = arith.constant 1.000000e+00 : f32
    %437 = vector.broadcast %cst_145 : f32 to vector<8x32xf32>
    %438 = arith.subf %437, %432 : vector<8x32xf32>
    %439 = arith.mulf %438, %435 : vector<8x32xf32>
    %440 = arith.addf %436, %439 : vector<8x32xf32>
    %441 = math.tanh %440 : vector<8x32xf32>
    %442 = arith.mulf %433, %441 : vector<8x32xf32>
    %443 = arith.index_cast %c7_i32_139 : i32 to index
    %c0_146 = arith.constant 0 : index
    %c0_147 = arith.constant 0 : index
    %444 = vector.load %arg6[%443, %c0_146, %c0_147] : memref<8x8x32xf32, #tpu.memory_space<vmem>>, vector<1x8x32xf32>
    %445 = vector.shape_cast %444 : vector<1x8x32xf32> to vector<8x32xf32>
    %446 = vector.shape_cast %442 : vector<8x32xf32> to vector<1x8x32xf32>
    tpu.vector_store %arg6[%443, %c0_146, %c0_147], %446 {strides = array<i32>} : memref<8x8x32xf32, #tpu.memory_space<vmem>>, vector<1x8x32xf32>,
    %c8_i32_148 = arith.constant 8 : i32
    %c0_149 = arith.constant 0 : index
    %c0_150 = arith.constant 0 : index
    %447 = vector.load %arg9[%c0_149, %c0_150] : memref<8x32xf32, #tpu.memory_space<vmem>>, vector<8x32xf32>
    tpu.vector_store %arg9[%c0_149, %c0_150], %442 {strides = array<i32>} : memref<8x32xf32, #tpu.memory_space<vmem>>, vector<8x32xf32>,
    %c0_151 = arith.constant 0 : index
    %c0_152 = arith.constant 0 : index
    %448 = vector.load %arg10[%c0_151, %c0_152] : memref<8x32xf32, #tpu.memory_space<vmem>>, vector<8x32xf32>
    tpu.vector_store %arg10[%c0_151, %c0_152], %440 {strides = array<i32>} : memref<8x32xf32, #tpu.memory_space<vmem>>, vector<8x32xf32>,
    return
  }
  func.func @transform_0(%arg0: i32) -> (i32, i32, i32) {
    %c0_i32 = arith.constant 0 : i32
    %c0_i32_0 = arith.constant 0 : i32
    %c0_i32_1 = arith.constant 0 : i32
    return %arg0, %c0_i32, %c0_i32_0 : i32, i32, i32
  }
  func.func @transform_1(%arg0: i32) -> (i32, i32) {
    %c0_i32 = arith.constant 0 : i32
    %c0_i32_0 = arith.constant 0 : i32
    %c0_i32_1 = arith.constant 0 : i32
    return %c0_i32, %c0_i32_0 : i32, i32
  }
  func.func @transform_2(%arg0: i32) -> (i32, i32) {
    %c0_i32 = arith.constant 0 : i32
    %c0_i32_0 = arith.constant 0 : i32
    %c0_i32_1 = arith.constant 0 : i32
    return %c0_i32, %c0_i32_0 : i32, i32
  }
  func.func @transform_3(%arg0: i32) -> (i32, i32) {
    %c0_i32 = arith.constant 0 : i32
    %c0_i32_0 = arith.constant 0 : i32
    %c0_i32_1 = arith.constant 0 : i32
    return %c0_i32, %c0_i32_0 : i32, i32
  }
  func.func @transform_4(%arg0: i32) -> (i32, i32) {
    %c0_i32 = arith.constant 0 : i32
    %c0_i32_0 = arith.constant 0 : i32
    %c0_i32_1 = arith.constant 0 : i32
    return %c0_i32, %c0_i32_0 : i32, i32
  }
  func.func @transform_5(%arg0: i32) -> (i32, i32, i32) {
    %c0_i32 = arith.constant 0 : i32
    %c0_i32_0 = arith.constant 0 : i32
    %c0_i32_1 = arith.constant 0 : i32
    return %arg0, %c0_i32, %c0_i32_0 : i32, i32, i32
  }
  func.func @transform_6(%arg0: i32) -> (i32, i32) {
    %c0_i32 = arith.constant 0 : i32
    %c0_i32_0 = arith.constant 0 : i32
    %c0_i32_1 = arith.constant 0 : i32
    return %c0_i32, %c0_i32_0 : i32, i32
  }
  func.func @transform_7(%arg0: i32) -> (i32, i32) {
    %c0_i32 = arith.constant 0 : i32
    %c0_i32_0 = arith.constant 0 : i32
    %c0_i32_1 = arith.constant 0 : i32
    return %c0_i32, %c0_i32_0 : i32, i32
  }
  func.func @transform_8(%arg0: i32) -> (i32, i32) {
    %c0_i32 = arith.constant 0 : i32
    %c0_i32_0 = arith.constant 0 : i32
    %c0_i32_1 = arith.constant 0 : i32
    return %c0_i32, %c0_i32_0 : i32, i32
  }
  func.func @transform_9(%arg0: i32) -> (i32, i32) {
    %c0_i32 = arith.constant 0 : i32
    %c0_i32_0 = arith.constant 0 : i32
    %c0_i32_1 = arith.constant 0 : i32
    return %c0_i32, %c0_i32_0 : i32, i32
  }
}

</mosaic_0001>

<bundles_post_ra>
// kernel: lstm_forward.1
= control target key start
LH: loop header
LB: loop body
LE: loop exit
PB: predicated region body
PF: predicated region fallthrough
CT: control target
= control target key end

     0   :  { %vm29_vm0 = vcmask 261120   ;;  %v2861_v0 = vmov 0.0   ;;  %vm2862_vm1 = vmmov 0   ;;  %s2863_s24 = smov 64   ;;  %s2864_s27 = smov 32   ;;  %s3435_s1 = inlined_call_operand.vmem [shape: f32[32,96], index: 1, kind: input, shape index: {}]   ;;  %s3436_s6 = inlined_call_operand.vmem [shape: f32[8,32], index: 6, kind: output, shape index: {1}]   ;;  %s3437_s7 = inlined_call_operand.vmem [shape: f32[8,32], index: 7, kind: output, shape index: {2}]   ;;  %s3438_s0 = inlined_call_operand.vmem [shape: f32[8,8,96], index: 0, kind: input, shape index: {}]   ;;  %s3439_s3 = inlined_call_operand.vmem [shape: f32[32,96], index: 3, kind: input, shape index: {}]   ;;  %s3440_s8 = inlined_call_operand.vmem [shape: f32[8,32], index: 8, kind: output, shape index: {3}]   ;;  %s3441_s2 = inlined_call_operand.vmem [shape: f32[32,96], index: 2, kind: input, shape index: {}]   ;;  %s3442_s9 = inlined_call_operand.vmem [shape: f32[8,32], index: 9, kind: output, shape index: {4}]   ;;  %s3443_s4 = inlined_call_operand.vmem [shape: f32[1,96], index: 4, kind: input, shape index: {}]   ;;  %s3444_s5 = inlined_call_operand.vmem [shape: f32[8,8,32], index: 5, kind: output, shape index: {0}]  }
   0x1   :  { %2464 = vmatprep.subr.mxu0 %v2861_v0  ;;  %v2920_v1 = vld [vmem:[%s3435_s1 + $0x18] sm:$0xff]  ;;  %v2925_v2 = vld [vmem:[%s3435_s1 + $0x10] sm:$0xff]  ;;  %2472 = vmatprep.mubr.msk.f32.mxu0 %vm2862_vm1, %v2861_v0  ;;  %30 = vst.msk [vmem:[%s3436_s6] sm:$0xff] %vm29_vm0, %v2861_v0  ;;  %v2940_v3 = vld [vmem:[%s3435_s1 + $0x8] sm:$0xff]  ;;  %s2865_s28 = smov 96  }
   0x2   :  { %2465 = vmatpush3.msra.mxu0 %v2920_v1  ;;  %2475 = vmatprep.subr.mxu1 %v2861_v0  ;;  %v2949_v4 = vld [vmem:[%s3435_s1] sm:$0xff]  ;;  %31 = vst.msk [vmem:[%s3437_s7] sm:$0xff] %vm29_vm0, %v2861_v0  ;;  %v2291_v25 = vld [vmem:[%s3438_s0 + $0x8] sm:$0xff]  ;;  %v2294_v43 = vld [vmem:[%s3438_s0 + $0x10] sm:$0xff] }
   0x3   :  { %2466 = vmatprep.subr.mxu0 %v2861_v0  ;;  %2476 = vmatpush3.msra.mxu1 %v2920_v1  ;;  %v40_v6 = vld [vmem:[%s3438_s0] sm:$0xff]  ;;  %v2297_v61 = vld [vmem:[%s3438_s0 + $0x18] sm:$0xff]  ;;  %32 = vst.msk [vmem:[%s3440_s8] sm:$0xff] %vm29_vm0, %v2861_v0  ;;  %33 = vst.msk [vmem:[%s3442_s9] sm:$0xff] %vm29_vm0, %v2861_v0 }
   0x4   :  { %2467 = vmatpush3.msra.mxu0 %v2925_v2  ;;  %2477 = vmatprep.subr.mxu1 %v2861_v0 }
   0x5   :  { %2468 = vmatprep.subr.mxu0 %v2861_v0  ;;  %2478 = vmatpush3.msra.mxu1 %v2925_v2 }
   0x6   :  { %2469 = vmatpush3.msra.mxu0 %v2940_v3  ;;  %2479 = vmatprep.subr.mxu1 %v2861_v0 }
   0x7   :  { %2470 = vmatprep.subr.mxu0 %v2861_v0  ;;  %2480 = vmatpush3.msra.mxu1 %v2940_v3 }
   0x8   :  { %2471 = vmatpush3.msra.mxu0 %v2949_v4  ;;  %v38_v5 = vld [vmem:[%s3436_s6] sm:$0xff]  ;;  %2481 = vmatprep.subr.mxu1 %v2861_v0 }
   0x9   :  { %2473 = vmatmul.mubr.msk.f32.vlgmr.msra.gmra.mxu0 %vm29_vm0, %v38_v5  ;;  %2482 = vmatpush3.msra.mxu1 %v2949_v4  ;;  %v39_v15 = vld [vmem:[%s3437_s7] sm:$0xff] }
   0xa   :  { %2483 = vmatprep.mubr.msk.f32.mxu1 %vm2862_vm1, %v2861_v0  ;;  %2486 = vmatprep.subr.mxu0 %v2861_v0 }
   0xb   :  { %2487 = vmatpush3.msra.mxu0 %v2920_v1  ;;  %2494 = vmatprep.mubr.msk.f32.mxu0 %vm2862_vm1, %v2861_v0 }
   0xc   :  { %2488 = vmatprep.subr.mxu0 %v2861_v0  ;;  %2497 = vmatprep.subr.mxu1 %v2861_v0 }
   0xd   :  { %2489 = vmatpush3.msra.mxu0 %v2925_v2 }
   0xe   :  { %2490 = vmatprep.subr.mxu0 %v2861_v0 }
   0xf   :  { %2491 = vmatpush3.msra.mxu0 %v2940_v3 }
  0x10   :  { %2492 = vmatprep.subr.mxu0 %v2861_v0 }
  0x11   :  { %2493 = vmatpush3.msra.mxu0 %v2949_v4 }
  0x12   :  { %2508 = vmatprep.subr.mxu0 %v2861_v0 }
  0xc9   :  { %v111_v7 = vpop.f32.mrf.mxu0 }
  0xca   :  { %v115_v8 = vadd.f32 %v111_v7, %v40_v6 }
  0xcb   :  { %v2474_v9 = vpop.f32.mrf.mxu0 }
  0xcc   :  { %2733 = vtanh.f32 %v115_v8  ;;  %v2290_v11 = vmul.f32 -1.442695, %v115_v8 }
  0xce   :  { %2735 = vpow2.f32 %v2290_v11 }
  0xd9   :  { %v2734_v10 = vpop.eup %2733 }
  0xda   :  { %126 = vrot.lane.b32.xlu0 %v2734_v10, %s2863_s24 }
  0xdb   :  { %v2736_v12 = vpop.eup %2735 }
  0xdc   :  { %v119_v13 = vadd.f32 1.0, %v2736_v12 }
  0xde   :  { %2737 = vrcp.f32 %v119_v13 }
  0xeb   :  { %v2738_v14 = vpop.eup %2737 }
  0xec   :  { %v124_v16 = vsub.f32 1.0, %v2738_v14  ;;  %v123_v18 = vmul.f32 %v2738_v14, %v39_v15 }
 0x14c   :  { %v127_v17 = vpop.permute.xlu0 %126 }
 0x14d   :  { %v129_v19 = vmul.f32 %v127_v17, %v124_v16 }
 0x14f   :  { %v130_v20 = vadd.f32 %v129_v19, %v123_v18 }
 0x151   :  { %2739 = vtanh.f32 %v130_v20 }
 0x15e   :  { %v2740_v21 = vpop.eup %2739 }
 0x15f   :  { %133 = vrot.lane.b32.xlu0 %v2740_v21, %s2864_s27 }
 0x1d1   :  { %v134_v22 = vpop.permute.xlu0 %133 }
 0x1d2   :  { %v136_v23 = vmul.f32 %v2738_v14, %v134_v22 }
 0x1d4   :  { %138 = vrot.lane.b32.xlu1 %v136_v23, %s2865_s28 }
 0x246   :  { %v139_v24 = vpop.permute.xlu1 %138 }
 0x247   :  { %141 = vst.msk [vmem:[#allocation2] sm:$0xff] %vm29_vm0, %v139_v24  ;;  %2484 = vmatmul.mubr.msk.f32.vlgmr.msra.gmra.mxu1 %vm29_vm0, %v139_v24 }
 0x248   :  { %2498 = vmatpush3.msra.mxu1 %v2920_v1  ;;  %2505 = vmatprep.mubr.msk.f32.mxu1 %vm2862_vm1, %v2861_v0 }
 0x249   :  { %2499 = vmatprep.subr.mxu1 %v2861_v0 }
 0x24a   :  { %2500 = vmatpush3.msra.mxu1 %v2925_v2 }
 0x24b   :  { %2501 = vmatprep.subr.mxu1 %v2861_v0 }
 0x24c   :  { %2502 = vmatpush3.msra.mxu1 %v2940_v3 }
 0x24d   :  { %2503 = vmatprep.subr.mxu1 %v2861_v0 }
 0x24e   :  { %2504 = vmatpush3.msra.mxu1 %v2949_v4 }
 0x24f   :  { %2519 = vmatprep.subr.mxu1 %v2861_v0 }
 0x307   :  { %v212_v26 = vpop.f32.mrf.mxu1 }
 0x308   :  { %v216_v27 = vadd.f32 %v2291_v25, %v212_v26 }
 0x309   :  { %v2485_v28 = vpop.f32.mrf.mxu1 }
 0x30a   :  { %2741 = vtanh.f32 %v216_v27  ;;  %v2293_v30 = vmul.f32 -1.442695, %v216_v27 }
 0x30c   :  { %2743 = vpow2.f32 %v2293_v30 }
 0x317   :  { %v2742_v29 = vpop.eup %2741 }
 0x318   :  { %227 = vrot.lane.b32.xlu1 %v2742_v29, %s2863_s24 }
 0x319   :  { %v2744_v31 = vpop.eup %2743 }
 0x31a   :  { %v220_v32 = vadd.f32 1.0, %v2744_v31 }
 0x31c   :  { %2745 = vrcp.f32 %v220_v32 }
 0x329   :  { %v2746_v33 = vpop.eup %2745 }
 0x32a   :  { %v225_v34 = vsub.f32 1.0, %v2746_v33  ;;  %v224_v36 = vmul.f32 %v2746_v33, %v130_v20  ;;  %v2300_v20 = vld [vmem:[%s3438_s0 + $0x20] sm:$0xff] }
 0x38a   :  { %v228_v35 = vpop.permute.xlu1 %227 }
 0x38b   :  { %v230_v37 = vmul.f32 %v228_v35, %v225_v34 }
 0x38d   :  { %v231_v38 = vadd.f32 %v230_v37, %v224_v36 }
 0x38f   :  { %2747 = vtanh.f32 %v231_v38 }
 0x39c   :  { %v2748_v39 = vpop.eup %2747 }
 0x39d   :  { %234 = vrot.lane.b32.xlu0 %v2748_v39, %s2864_s27 }
 0x40f   :  { %v235_v40 = vpop.permute.xlu0 %234 }
 0x410   :  { %v237_v41 = vmul.f32 %v2746_v33, %v235_v40 }
 0x412   :  { %239 = vrot.lane.b32.xlu1 %v237_v41, %s2865_s28 }
 0x484   :  { %v240_v42 = vpop.permute.xlu1 %239 }
 0x485   :  { %243 = vst.msk [vmem:[#allocation2 + $0x8] sm:$0xff] %vm29_vm0, %v240_v42  ;;  %2495 = vmatmul.mubr.msk.f32.vlgmr.msra.gmra.mxu0 %vm29_vm0, %v240_v42 }
 0x486   :  { %2509 = vmatpush3.msra.mxu0 %v2920_v1  ;;  %2516 = vmatprep.mubr.msk.f32.mxu0 %vm2862_vm1, %v2861_v0 }
 0x487   :  { %2510 = vmatprep.subr.mxu0 %v2861_v0 }
 0x488   :  { %2511 = vmatpush3.msra.mxu0 %v2925_v2 }
 0x489   :  { %2512 = vmatprep.subr.mxu0 %v2861_v0 }
 0x48a   :  { %2513 = vmatpush3.msra.mxu0 %v2940_v3 }
 0x48b   :  { %2514 = vmatprep.subr.mxu0 %v2861_v0 }
 0x48c   :  { %2515 = vmatpush3.msra.mxu0 %v2949_v4 }
 0x48d   :  { %2530 = vmatprep.subr.mxu0 %v2861_v0 }
 0x545   :  { %v314_v44 = vpop.f32.mrf.mxu0 }
 0x546   :  { %v318_v45 = vadd.f32 %v2294_v43, %v314_v44 }
 0x547   :  { %v2496_v46 = vpop.f32.mrf.mxu0 }
 0x548   :  { %2749 = vtanh.f32 %v318_v45  ;;  %v2296_v48 = vmul.f32 -1.442695, %v318_v45 }
 0x54a   :  { %2751 = vpow2.f32 %v2296_v48 }
 0x555   :  { %v2750_v47 = vpop.eup %2749 }
 0x556   :  { %329 = vrot.lane.b32.xlu0 %v2750_v47, %s2863_s24 }
 0x557   :  { %v2752_v49 = vpop.eup %2751 }
 0x558   :  { %v322_v50 = vadd.f32 1.0, %v2752_v49 }
 0x55a   :  { %2753 = vrcp.f32 %v322_v50 }
 0x567   :  { %v2754_v51 = vpop.eup %2753 }
 0x568   :  { %v327_v52 = vsub.f32 1.0, %v2754_v51  ;;  %v326_v54 = vmul.f32 %v2754_v51, %v231_v38 }
 0x5c8   :  { %v330_v53 = vpop.permute.xlu0 %329 }
 0x5c9   :  { %v332_v55 = vmul.f32 %v330_v53, %v327_v52  ;;  %v2306_v52 = vld [vmem:[%s3438_s0 + $0x30] sm:$0xff] }
 0x5cb   :  { %v333_v56 = vadd.f32 %v332_v55, %v326_v54 }
 0x5cd   :  { %2755 = vtanh.f32 %v333_v56 }
 0x5da   :  { %v2756_v57 = vpop.eup %2755 }
 0x5db   :  { %336 = vrot.lane.b32.xlu1 %v2756_v57, %s2864_s27 }
 0x64d   :  { %v337_v58 = vpop.permute.xlu1 %336 }
 0x64e   :  { %v339_v59 = vmul.f32 %v2754_v51, %v337_v58 }
 0x650   :  { %341 = vrot.lane.b32.xlu0 %v339_v59, %s2865_s28 }
 0x6c2   :  { %v342_v60 = vpop.permute.xlu0 %341 }
 0x6c3   :  { %345 = vst.msk [vmem:[#allocation2 + $0x10] sm:$0xff] %vm29_vm0, %v342_v60  ;;  %2506 = vmatmul.mubr.msk.f32.vlgmr.msra.gmra.mxu1 %vm29_vm0, %v342_v60 }
 0x6c4   :  { %2520 = vmatpush3.msra.mxu1 %v2920_v1  ;;  %2527 = vmatprep.mubr.msk.f32.mxu1 %vm2862_vm1, %v2861_v0 }
 0x6c5   :  { %2521 = vmatprep.subr.mxu1 %v2861_v0 }
 0x6c6   :  { %2522 = vmatpush3.msra.mxu1 %v2925_v2 }
 0x6c7   :  { %2523 = vmatprep.subr.mxu1 %v2861_v0 }
 0x6c8   :  { %2524 = vmatpush3.msra.mxu1 %v2940_v3 }
 0x6c9   :  { %2525 = vmatprep.subr.mxu1 %v2861_v0 }
 0x6ca   :  { %2526 = vmatpush3.msra.mxu1 %v2949_v4 }
 0x6cb   :  { %2541 = vmatprep.subr.mxu1 %v2861_v0 }
 0x783   :  { %v416_v62 = vpop.f32.mrf.mxu1 }
 0x784   :  { %v420_v63 = vadd.f32 %v2297_v61, %v416_v62 }
 0x785   :  { %v2507_v5 = vpop.f32.mrf.mxu1 }
 0x786   :  { %2757 = vtanh.f32 %v420_v63  ;;  %v2299_v7 = vmul.f32 -1.442695, %v420_v63 }
 0x788   :  { %2759 = vpow2.f32 %v2299_v7  ;;  %v3095_v7 = vld [vmem:[%s3439_s3 + $0x18] sm:$0xff] }
 0x793   :  { %v2758_v6 = vpop.eup %2757 }
 0x794   :  { %431 = vrot.lane.b32.xlu1 %v2758_v6, %s2863_s24 }
 0x795   :  { %v2760_v8 = vpop.eup %2759 }
 0x796   :  { %v424_v9 = vadd.f32 1.0, %v2760_v8 }
 0x798   :  { %2761 = vrcp.f32 %v424_v9  ;;  %v3108_v9 = vld [vmem:[%s3439_s3 + $0x10] sm:$0xff] }
 0x7a5   :  { %v2762_v10 = vpop.eup %2761 }
 0x7a6   :  { %v429_v11 = vsub.f32 1.0, %v2762_v10  ;;  %v428_v13 = vmul.f32 %v2762_v10, %v333_v56 }
 0x806   :  { %v432_v12 = vpop.permute.xlu1 %431 }
 0x807   :  { %v434_v14 = vmul.f32 %v432_v12, %v429_v11  ;;  %v3122_v11 = vld [vmem:[%s3439_s3] sm:$0xff] }
 0x808   :  { %v873_v12 = vld [vmem:[%s3440_s8] sm:$0xff] }
 0x809   :  { %v435_v15 = vadd.f32 %v434_v14, %v428_v13 }
 0x80b   :  { %2763 = vtanh.f32 %v435_v15 }
 0x818   :  { %v2764_v16 = vpop.eup %2763 }
 0x819   :  { %438 = vrot.lane.b32.xlu0 %v2764_v16, %s2864_s27 }
 0x88b   :  { %v439_v17 = vpop.permute.xlu0 %438 }
 0x88c   :  { %v441_v18 = vmul.f32 %v2762_v10, %v439_v17  ;;  %v3115_v10 = vld [vmem:[%s3439_s3 + $0x8] sm:$0xff]  ;;  %v3151_v17 = vld [vmem:[%s3441_s2 + $0x10] sm:$0xff] }
 0x88e   :  { %443 = vrot.lane.b32.xlu1 %v441_v18, %s2865_s28  ;;  %v3160_v18 = vld [vmem:[%s3441_s2 + $0x8] sm:$0xff] }
 0x900   :  { %v444_v19 = vpop.permute.xlu1 %443 }
 0x901   :  { %447 = vst.msk [vmem:[#allocation2 + $0x18] sm:$0xff] %vm29_vm0, %v444_v19  ;;  %2517 = vmatmul.mubr.msk.f32.vlgmr.msra.gmra.mxu0 %vm29_vm0, %v444_v19  ;;  %v3167_v19 = vld [vmem:[%s3441_s2] sm:$0xff] }
 0x902   :  { %2531 = vmatpush3.msra.mxu0 %v2920_v1  ;;  %2538 = vmatprep.mubr.msk.f32.mxu0 %vm2862_vm1, %v2861_v0 }
 0x903   :  { %2532 = vmatprep.subr.mxu0 %v2861_v0 }
 0x904   :  { %2533 = vmatpush3.msra.mxu0 %v2925_v2 }
 0x905   :  { %2534 = vmatprep.subr.mxu0 %v2861_v0 }
 0x906   :  { %2535 = vmatpush3.msra.mxu0 %v2940_v3 }
 0x907   :  { %2536 = vmatprep.subr.mxu0 %v2861_v0 }
 0x908   :  { %2537 = vmatpush3.msra.mxu0 %v2949_v4 }
 0x909   :  { %2552 = vmatprep.subr.mxu0 %v2861_v0 }
 0x9c1   :  { %v518_v21 = vpop.f32.mrf.mxu0 }
 0x9c2   :  { %v522_v22 = vadd.f32 %v2300_v20, %v518_v21  ;;  %v875_v20 = vld [vmem:[#allocation2] sm:$0xff]  ;;  %v1049_v21 = vld [vmem:[#allocation2 + $0x8] sm:$0xff] }
 0x9c3   :  { %v2518_v23 = vpop.f32.mrf.mxu0 }
 0x9c4   :  { %2765 = vtanh.f32 %v522_v22  ;;  %v2302_v25 = vmul.f32 -1.442695, %v522_v22  ;;  %v1223_v22 = vld [vmem:[#allocation2 + $0x10] sm:$0xff]  ;;  %v1397_v23 = vld [vmem:[#allocation2 + $0x18] sm:$0xff] }
 0x9c6   :  { %2767 = vpow2.f32 %v2302_v25 }
 0x9d1   :  { %v2766_v24 = vpop.eup %2765 }
 0x9d2   :  { %533 = vrot.lane.b32.xlu0 %v2766_v24, %s2863_s24 }
 0x9d3   :  { %v2768_v26 = vpop.eup %2767 }
 0x9d4   :  { %v526_v27 = vadd.f32 1.0, %v2768_v26 }
 0x9d6   :  { %2769 = vrcp.f32 %v526_v27 }
 0x9e3   :  { %v2770_v28 = vpop.eup %2769 }
 0x9e4   :  { %v531_v29 = vsub.f32 1.0, %v2770_v28  ;;  %v530_v31 = vmul.f32 %v2770_v28, %v435_v15  ;;  %v3144_v15 = vld [vmem:[%s3441_s2 + $0x18] sm:$0xff] }
 0xa44   :  { %v534_v30 = vpop.permute.xlu0 %533 }
 0xa45   :  { %v536_v32 = vmul.f32 %v534_v30, %v531_v29 }
 0xa47   :  { %v537_v33 = vadd.f32 %v536_v32, %v530_v31  ;;  %v3259_v31 = vld [vmem:[%s3443_s4] ss:$0 sm:$0xff] }
 0xa49   :  { %2771 = vtanh.f32 %v537_v33 }
 0xa56   :  { %v2772_v34 = vpop.eup %2771 }
 0xa57   :  { %540 = vrot.lane.b32.xlu1 %v2772_v34, %s2864_s27 }
 0xac9   :  { %v541_v35 = vpop.permute.xlu1 %540 }
 0xaca   :  { %v543_v36 = vmul.f32 %v2770_v28, %v541_v35 }
 0xacc   :  { %545 = vrot.lane.b32.xlu0 %v543_v36, %s2865_s28 }
 0xb3e   :  { %v546_v37 = vpop.permute.xlu0 %545 }
 0xb3f   :  { %549 = vst.msk [vmem:[#allocation2 + $0x20] sm:$0xff] %vm29_vm0, %v546_v37  ;;  %2528 = vmatmul.mubr.msk.f32.vlgmr.msra.gmra.mxu1 %vm29_vm0, %v546_v37 }
 0xb40   :  { %2542 = vmatpush3.msra.mxu1 %v2920_v1  ;;  %2549 = vmatprep.mubr.msk.f32.mxu1 %vm2862_vm1, %v2861_v0  ;;  %v2303_v1 = vld [vmem:[%s3438_s0 + $0x28] sm:$0xff] }
 0xb41   :  { %2543 = vmatprep.subr.mxu1 %v2861_v0 }
 0xb42   :  { %2544 = vmatpush3.msra.mxu1 %v2925_v2 }
 0xb43   :  { %2545 = vmatprep.subr.mxu1 %v2861_v0 }
 0xb44   :  { %2546 = vmatpush3.msra.mxu1 %v2940_v3 }
 0xb45   :  { %2547 = vmatprep.subr.mxu1 %v2861_v0 }
 0xb46   :  { %2548 = vmatpush3.msra.mxu1 %v2949_v4  ;;  %v1571_v24 = vld [vmem:[#allocation2 + $0x20] sm:$0xff] }
 0xb47   :  { %2563 = vmatprep.subr.mxu1 %v2861_v0 }
 0xbff   :  { %v620_v38 = vpop.f32.mrf.mxu1 }
 0xc00   :  { %v624_v39 = vadd.f32 %v2303_v1, %v620_v38 }
 0xc01   :  { %v2529_v40 = vpop.f32.mrf.mxu1 }
 0xc02   :  { %2773 = vtanh.f32 %v624_v39  ;;  %v2305_v2 = vmul.f32 -1.442695, %v624_v39 }
 0xc04   :  { %2775 = vpow2.f32 %v2305_v2 }
 0xc0f   :  { %v2774_v41 = vpop.eup %2773 }
 0xc10   :  { %635 = vrot.lane.b32.xlu1 %v2774_v41, %s2863_s24 }
 0xc11   :  { %v2776_v3 = vpop.eup %2775 }
 0xc12   :  { %v628_v42 = vadd.f32 1.0, %v2776_v3 }
 0xc14   :  { %2777 = vrcp.f32 %v628_v42 }
 0xc21   :  { %v2778_v43 = vpop.eup %2777 }
 0xc22   :  { %v633_v4 = vsub.f32 1.0, %v2778_v43  ;;  %v632_v45 = vmul.f32 %v2778_v43, %v537_v33 }
 0xc82   :  { %v636_v44 = vpop.permute.xlu1 %635 }
 0xc83   :  { %v638_v46 = vmul.f32 %v636_v44, %v633_v4 }
 0xc85   :  { %v639_v47 = vadd.f32 %v638_v46, %v632_v45 }
 0xc87   :  { %2779 = vtanh.f32 %v639_v47 }
 0xc94   :  { %v2780_v48 = vpop.eup %2779 }
 0xc95   :  { %642 = vrot.lane.b32.xlu0 %v2780_v48, %s2864_s27 }
 0xd07   :  { %v643_v49 = vpop.permute.xlu0 %642 }
 0xd08   :  { %v645_v50 = vmul.f32 %v2778_v43, %v643_v49  ;;  %v874_v49 = vld [vmem:[%s3442_s9] sm:$0xff] }
 0xd0a   :  { %647 = vrot.lane.b32.xlu1 %v645_v50, %s2865_s28 }
 0xd7c   :  { %v648_v51 = vpop.permute.xlu1 %647 }
 0xd7d   :  { %651 = vst.msk [vmem:[#allocation2 + $0x28] sm:$0xff] %vm29_vm0, %v648_v51  ;;  %2539 = vmatmul.mubr.msk.f32.vlgmr.msra.gmra.mxu0 %vm29_vm0, %v648_v51 }
 0xd7e   :  { %2560 = vmatprep.mubr.msk.f32.mxu0 %vm2862_vm1, %v2861_v0  ;;  %2553 = vmatpush3.msra.mxu0 %v3095_v7 }
 0xd7f   :  { %2554 = vmatprep.subr.mxu0 %v2861_v0 }
 0xd80   :  { %2555 = vmatpush3.msra.mxu0 %v3108_v9 }
 0xd81   :  { %2556 = vmatprep.subr.mxu0 %v2861_v0 }
 0xd82   :  { %2557 = vmatpush3.msra.mxu0 %v3115_v10 }
 0xd83   :  { %2558 = vmatprep.subr.mxu0 %v2861_v0 }
 0xd84   :  { %2559 = vmatpush3.msra.mxu0 %v3122_v11  ;;  %v1745_v25 = vld [vmem:[#allocation2 + $0x28] sm:$0xff] }
 0xd85   :  { %2561 = vmatmul.mubr.msk.f32.vlgmr.msra.gmra.mxu0 %vm29_vm0, %v873_v12  ;;  %2574 = vmatprep.subr.mxu0 %v2861_v0 }
 0xd86   :  { %2575 = vmatpush3.msra.mxu0 %v3095_v7  ;;  %2582 = vmatprep.mubr.msk.f32.mxu0 %vm2862_vm1, %v2861_v0 }
 0xd87   :  { %2576 = vmatprep.subr.mxu0 %v2861_v0 }
 0xd88   :  { %2577 = vmatpush3.msra.mxu0 %v3108_v9 }
 0xd89   :  { %2578 = vmatprep.subr.mxu0 %v2861_v0 }
 0xd8a   :  { %2579 = vmatpush3.msra.mxu0 %v3115_v10 }
 0xd8b   :  { %2580 = vmatprep.subr.mxu0 %v2861_v0 }
 0xd8c   :  { %2581 = vmatpush3.msra.mxu0 %v3122_v11 }
 0xd8d   :  { %2596 = vmatprep.subr.mxu0 %v2861_v0 }
 0xe3d   :  { %v722_v53 = vpop.f32.mrf.mxu0 }
 0xe3e   :  { %v726_v54 = vadd.f32 %v2306_v52, %v722_v53 }
 0xe3f   :  { %v2540_v55 = vpop.f32.mrf.mxu0 }
 0xe40   :  { %2781 = vtanh.f32 %v726_v54  ;;  %v2308_v57 = vmul.f32 -1.442695, %v726_v54 }
 0xe42   :  { %2783 = vpow2.f32 %v2308_v57 }
 0xe45   :  { %v945_v27 = vpop.f32.mrf.mxu0 }
 0xe47   :  { %v2562_v28 = vpop.f32.mrf.mxu0 }
 0xe4d   :  { %v2782_v56 = vpop.eup %2781 }
 0xe4e   :  { %737 = vrot.lane.b32.xlu0 %v2782_v56, %s2863_s24 }
 0xe4f   :  { %v2784_v58 = vpop.eup %2783 }
 0xe50   :  { %v730_v59 = vadd.f32 1.0, %v2784_v58 }
 0xe52   :  { %2785 = vrcp.f32 %v730_v59 }
 0xe5f   :  { %v2786_v60 = vpop.eup %2785 }
 0xe60   :  { %v735_v61 = vsub.f32 1.0, %v2786_v60  ;;  %v734_v63 = vmul.f32 %v2786_v60, %v639_v47 }
 0xec0   :  { %v738_v62 = vpop.permute.xlu0 %737 }
 0xec1   :  { %v740_v5 = vmul.f32 %v738_v62, %v735_v61 }
 0xec3   :  { %v3089_v6 = vadd.f32 %v740_v5, %v734_v63 }
 0xec5   :  { %2787 = vtanh.f32 %v3089_v6 }
 0xed2   :  { %v2788_v8 = vpop.eup %2787 }
 0xed3   :  { %744 = vrot.lane.b32.xlu1 %v2788_v8, %s2864_s27 }
 0xf45   :  { %v745_v13 = vpop.permute.xlu1 %744 }
 0xf46   :  { %v747_v14 = vmul.f32 %v2786_v60, %v745_v13 }
 0xf48   :  { %749 = vrot.lane.b32.xlu0 %v747_v14, %s2865_s28 }
 0xfba   :  { %v750_v16 = vpop.permute.xlu0 %749 }
 0xfbb   :  { %753 = vst.msk [vmem:[#allocation2 + $0x30] sm:$0xff] %vm29_vm0, %v750_v16  ;;  %2550 = vmatmul.mubr.msk.f32.vlgmr.msra.gmra.mxu1 %vm29_vm0, %v750_v16 }
 0xfbc   :  { %2564 = vmatpush3.msra.mxu1 %v3144_v15  ;;  %2571 = vmatprep.mubr.msk.f32.mxu1 %vm2862_vm1, %v2861_v0 }
 0xfbd   :  { %2565 = vmatprep.subr.mxu1 %v2861_v0 }
 0xfbe   :  { %2566 = vmatpush3.msra.mxu1 %v3151_v17 }
 0xfbf   :  { %2567 = vmatprep.subr.mxu1 %v2861_v0 }
 0xfc0   :  { %2568 = vmatpush3.msra.mxu1 %v3160_v18 }
 0xfc1   :  { %2569 = vmatprep.subr.mxu1 %v2861_v0 }
 0xfc2   :  { %2570 = vmatpush3.msra.mxu1 %v3167_v19  ;;  %v1919_v26 = vld [vmem:[#allocation2 + $0x30] sm:$0xff] }
 0xfc3   :  { %2572 = vmatmul.mubr.msk.f32.vlgmr.msra.gmra.mxu1 %vm29_vm0, %v875_v20  ;;  %2585 = vmatprep.subr.mxu1 %v2861_v0 }
 0xfc4   :  { %2586 = vmatpush3.msra.mxu1 %v3144_v15  ;;  %2593 = vmatprep.mubr.msk.f32.mxu1 %vm2862_vm1, %v2861_v0 }
 0xfc5   :  { %2587 = vmatprep.subr.mxu1 %v2861_v0 }
 0xfc6   :  { %2588 = vmatpush3.msra.mxu1 %v3151_v17 }
 0xfc7   :  { %2589 = vmatprep.subr.mxu1 %v2861_v0 }
 0xfc8   :  { %2590 = vmatpush3.msra.mxu1 %v3160_v18 }
 0xfc9   :  { %2591 = vmatprep.subr.mxu1 %v2861_v0 }
 0xfca   :  { %2592 = vmatpush3.msra.mxu1 %v3167_v19 }
 0xfcb   :  { %2594 = vmatmul.mubr.msk.f32.vlgmr.msra.gmra.mxu1 %vm29_vm0, %v1049_v21  ;;  %2607 = vmatprep.subr.mxu1 %v2861_v0 }
 0xfcc   :  { %2608 = vmatpush3.msra.mxu1 %v3144_v15  ;;  %2615 = vmatprep.mubr.msk.f32.mxu1 %vm2862_vm1, %v2861_v0 }
 0xfcd   :  { %2609 = vmatprep.subr.mxu1 %v2861_v0 }
 0xfce   :  { %2610 = vmatpush3.msra.mxu1 %v3151_v17 }
 0xfcf   :  { %2611 = vmatprep.subr.mxu1 %v2861_v0 }
 0xfd0   :  { %2612 = vmatpush3.msra.mxu1 %v3160_v18 }
 0xfd1   :  { %2613 = vmatprep.subr.mxu1 %v2861_v0 }
 0xfd2   :  { %2614 = vmatpush3.msra.mxu1 %v3167_v19 }
 0xfd3   :  { %2616 = vmatmul.mubr.msk.f32.vlgmr.msra.gmra.mxu1 %vm29_vm0, %v1223_v22  ;;  %2629 = vmatprep.subr.mxu1 %v2861_v0 }
 0xfd4   :  { %2630 = vmatpush3.msra.mxu1 %v3144_v15  ;;  %2637 = vmatprep.mubr.msk.f32.mxu1 %vm2862_vm1, %v2861_v0 }
 0xfd5   :  { %2631 = vmatprep.subr.mxu1 %v2861_v0 }
 0xfd6   :  { %2632 = vmatpush3.msra.mxu1 %v3151_v17 }
 0xfd7   :  { %2633 = vmatprep.subr.mxu1 %v2861_v0 }
 0xfd8   :  { %2634 = vmatpush3.msra.mxu1 %v3160_v18 }
 0xfd9   :  { %2635 = vmatprep.subr.mxu1 %v2861_v0 }
 0xfda   :  { %2636 = vmatpush3.msra.mxu1 %v3167_v19 }
 0xfdb   :  { %2638 = vmatmul.mubr.msk.f32.vlgmr.msra.gmra.mxu1 %vm29_vm0, %v1397_v23  ;;  %2651 = vmatprep.subr.mxu1 %v2861_v0 }
 0xfdc   :  { %2652 = vmatpush3.msra.mxu1 %v3144_v15  ;;  %2659 = vmatprep.mubr.msk.f32.mxu1 %vm2862_vm1, %v2861_v0 }
 0xfdd   :  { %2653 = vmatprep.subr.mxu1 %v2861_v0 }
 0xfde   :  { %2654 = vmatpush3.msra.mxu1 %v3151_v17 }
 0xfdf   :  { %2655 = vmatprep.subr.mxu1 %v2861_v0 }
 0xfe0   :  { %2656 = vmatpush3.msra.mxu1 %v3160_v18 }
 0xfe1   :  { %2657 = vmatprep.subr.mxu1 %v2861_v0 }
 0xfe2   :  { %2658 = vmatpush3.msra.mxu1 %v3167_v19 }
 0xfe3   :  { %2660 = vmatmul.mubr.msk.f32.vlgmr.msra.gmra.mxu1 %vm29_vm0, %v1571_v24  ;;  %2673 = vmatprep.subr.mxu1 %v2861_v0 }
 0xfe4   :  { %2674 = vmatpush3.msra.mxu1 %v3144_v15  ;;  %2681 = vmatprep.mubr.msk.f32.mxu1 %vm2862_vm1, %v2861_v0 }
 0xfe5   :  { %2675 = vmatprep.subr.mxu1 %v2861_v0 }
 0xfe6   :  { %2676 = vmatpush3.msra.mxu1 %v3151_v17 }
 0xfe7   :  { %2677 = vmatprep.subr.mxu1 %v2861_v0 }
 0xfe8   :  { %2678 = vmatpush3.msra.mxu1 %v3160_v18 }
 0xfe9   :  { %2679 = vmatprep.subr.mxu1 %v2861_v0 }
 0xfea   :  { %2680 = vmatpush3.msra.mxu1 %v3167_v19 }
 0xfeb   :  { %2682 = vmatmul.mubr.msk.f32.vlgmr.msra.gmra.mxu1 %vm29_vm0, %v1745_v25  ;;  %2695 = vmatprep.subr.mxu1 %v2861_v0 }
 0xfec   :  { %2696 = vmatpush3.msra.mxu1 %v3144_v15  ;;  %2703 = vmatprep.mubr.msk.f32.mxu1 %vm2862_vm1, %v2861_v0 }
 0xfed   :  { %2697 = vmatprep.subr.mxu1 %v2861_v0 }
 0xfee   :  { %2698 = vmatpush3.msra.mxu1 %v3151_v17 }
 0xfef   :  { %2699 = vmatprep.subr.mxu1 %v2861_v0 }
 0xff0   :  { %2700 = vmatpush3.msra.mxu1 %v3160_v18 }
 0xff1   :  { %2701 = vmatprep.subr.mxu1 %v2861_v0 }
 0xff2   :  { %2702 = vmatpush3.msra.mxu1 %v3167_v19 }
 0xff3   :  { %2704 = vmatmul.mubr.msk.f32.vlgmr.msra.gmra.mxu1 %vm29_vm0, %v1919_v26  ;;  %2717 = vmatprep.subr.mxu1 %v2861_v0 }
 0xff4   :  { %2718 = vmatpush3.msra.mxu1 %v3144_v15  ;;  %2725 = vmatprep.mubr.msk.f32.mxu1 %vm2862_vm1, %v2861_v0 }
 0xff5   :  { %2719 = vmatprep.subr.mxu1 %v2861_v0 }
 0xff6   :  { %2720 = vmatpush3.msra.mxu1 %v3151_v17 }
 0xff7   :  { %2721 = vmatprep.subr.mxu1 %v2861_v0 }
 0xff8   :  { %2722 = vmatpush3.msra.mxu1 %v3160_v18 }
 0xff9   :  { %2723 = vmatprep.subr.mxu1 %v2861_v0 }
 0xffa   :  { %2724 = vmatpush3.msra.mxu1 %v3167_v19 }
0x107b   :  { %v3254_v29 = vpop.f32.mrf.mxu1 }
0x107d   :  { %v2551_v30 = vpop.f32.mrf.mxu1 }
0x1083   :  { %v1018_v32 = vpop.f32.mrf.mxu1 }
0x1084   :  { %v1019_v33 = vadd.f32 %v1018_v32, %v945_v27 }
0x1085   :  { %v2573_v34 = vpop.f32.mrf.mxu1 }
0x1086   :  { %v1022_v35 = vadd.f32 %v3259_v31, %v1019_v33 }
0x1088   :  { %2789 = vtanh.f32 %v1022_v35  ;;  %v2315_v45 = vmul.f32 -1.442695, %v1022_v35 }
0x108a   :  { %2791 = vpow2.f32 %v2315_v45 }
0x108b   :  { %v1191_v36 = vpop.f32.mrf.mxu1 }
0x108d   :  { %v2595_v37 = vpop.f32.mrf.mxu1 }
0x1093   :  { %v3262_v1 = vpop.f32.mrf.mxu1 }
0x1095   :  { %v2790_v38 = vpop.eup %2789  ;;  %v2617_v39 = vpop.f32.mrf.mxu1 }
0x1096   :  { %1033 = vrot.lane.b32.xlu1 %v2790_v38, %s2863_s24 }
0x1097   :  { %v2792_v46 = vpop.eup %2791 }
0x1098   :  { %v1026_v47 = vadd.f32 1.0, %v2792_v46 }
0x109a   :  { %2793 = vrcp.f32 %v1026_v47 }
0x109b   :  { %v3265_v40 = vpop.f32.mrf.mxu1 }
0x109d   :  { %v2639_v41 = vpop.f32.mrf.mxu1 }
0x10a3   :  { %v3267_v2 = vpop.f32.mrf.mxu1 }
0x10a5   :  { %v2661_v3 = vpop.f32.mrf.mxu1 }
0x10a7   :  { %v2794_v48 = vpop.eup %2793 }
0x10a8   :  { %v1031_v50 = vsub.f32 1.0, %v2794_v48  ;;  %v1030_v52 = vmul.f32 %v2794_v48, %v874_v49 }
0x10ab   :  { %v3269_v42 = vpop.f32.mrf.mxu1 }
0x10ad   :  { %v2683_v43 = vpop.f32.mrf.mxu1 }
0x10b3   :  { %v3271_v4 = vpop.f32.mrf.mxu1 }
0x10b5   :  { %v2705_v44 = vpop.f32.mrf.mxu1 }
0x1108   :  { %v1034_v51 = vpop.permute.xlu1 %1033 }
0x1109   :  { %v1036_v53 = vmul.f32 %v1034_v51, %v1031_v50 }
0x110b   :  { %v1037_v54 = vadd.f32 %v1036_v53, %v1030_v52 }
0x110d   :  { %2795 = vtanh.f32 %v1037_v54 }
0x111a   :  { %v2796_v55 = vpop.eup %2795 }
0x111b   :  { %1040 = vrot.lane.b32.xlu0 %v2796_v55, %s2864_s27 }
0x118d   :  { %v1041_v56 = vpop.permute.xlu0 %1040 }
0x118e   :  { %v1043_v57 = vmul.f32 %v2794_v48, %v1041_v56 }
0x1190   :  { %1045 = vrot.lane.b32.xlu1 %v1043_v57, %s2865_s28 }
0x1202   :  { %v1046_v58 = vpop.permute.xlu1 %1045 }
0x1203   :  { %1048 = vst.msk [vmem:[%s3444_s5] sm:$0xff] %vm29_vm0, %v1046_v58  ;;  %2583 = vmatmul.mubr.msk.f32.vlgmr.msra.gmra.mxu0 %vm29_vm0, %v1046_v58 }
0x1204   :  { %2597 = vmatpush3.msra.mxu0 %v3095_v7  ;;  %2604 = vmatprep.mubr.msk.f32.mxu0 %vm2862_vm1, %v2861_v0 }
0x1205   :  { %2598 = vmatprep.subr.mxu0 %v2861_v0 }
0x1206   :  { %2599 = vmatpush3.msra.mxu0 %v3108_v9 }
0x1207   :  { %2600 = vmatprep.subr.mxu0 %v2861_v0 }
0x1208   :  { %2601 = vmatpush3.msra.mxu0 %v3115_v10 }
0x1209   :  { %2602 = vmatprep.subr.mxu0 %v2861_v0 }
0x120a   :  { %2603 = vmatpush3.msra.mxu0 %v3122_v11 }
0x120b   :  { %2618 = vmatprep.subr.mxu0 %v2861_v0 }
0x12c3   :  { %v1118_v59 = vpop.f32.mrf.mxu0 }
0x12c4   :  { %v1192_v60 = vadd.f32 %v1191_v36, %v1118_v59 }
0x12c5   :  { %v2584_v61 = vpop.f32.mrf.mxu0 }
0x12c6   :  { %v1195_v62 = vadd.f32 %v3259_v31, %v1192_v60 }
0x12c8   :  { %2797 = vtanh.f32 %v1195_v62  ;;  %v2318_v5 = vmul.f32 -1.442695, %v1195_v62 }
0x12ca   :  { %2799 = vpow2.f32 %v2318_v5 }
0x12d5   :  { %v2798_v63 = vpop.eup %2797 }
0x12d6   :  { %1206 = vrot.lane.b32.xlu0 %v2798_v63, %s2863_s24 }
0x12d7   :  { %v2800_v8 = vpop.eup %2799 }
0x12d8   :  { %v1199_v12 = vadd.f32 1.0, %v2800_v8 }
0x12da   :  { %2801 = vrcp.f32 %v1199_v12 }
0x12e7   :  { %v2802_v13 = vpop.eup %2801 }
0x12e8   :  { %v1204_v14 = vsub.f32 1.0, %v2802_v13  ;;  %v1203_v16 = vmul.f32 %v2802_v13, %v1037_v54 }
0x1348   :  { %v1207_v15 = vpop.permute.xlu0 %1206 }
0x1349   :  { %v1209_v17 = vmul.f32 %v1207_v15, %v1204_v14 }
0x134b   :  { %v1210_v18 = vadd.f32 %v1209_v17, %v1203_v16 }
0x134d   :  { %2803 = vtanh.f32 %v1210_v18 }
0x135a   :  { %v2804_v19 = vpop.eup %2803 }
0x135b   :  { %1213 = vrot.lane.b32.xlu1 %v2804_v19, %s2864_s27 }
0x13cd   :  { %v1214_v20 = vpop.permute.xlu1 %1213 }
0x13ce   :  { %v1216_v21 = vmul.f32 %v2802_v13, %v1214_v20 }
0x13d0   :  { %1218 = vrot.lane.b32.xlu0 %v1216_v21, %s2865_s28 }
0x1442   :  { %v1219_v22 = vpop.permute.xlu0 %1218 }
0x1443   :  { %2319 = vst.msk [vmem:[%s3444_s5 + $0x8] sm:$0xff] %vm29_vm0, %v1219_v22  ;;  %2605 = vmatmul.mubr.msk.f32.vlgmr.msra.gmra.mxu0 %vm29_vm0, %v1219_v22 }
0x1444   :  { %2619 = vmatpush3.msra.mxu0 %v3095_v7  ;;  %2626 = vmatprep.mubr.msk.f32.mxu0 %vm2862_vm1, %v2861_v0 }
0x1445   :  { %2620 = vmatprep.subr.mxu0 %v2861_v0 }
0x1446   :  { %2621 = vmatpush3.msra.mxu0 %v3108_v9 }
0x1447   :  { %2622 = vmatprep.subr.mxu0 %v2861_v0 }
0x1448   :  { %2623 = vmatpush3.msra.mxu0 %v3115_v10 }
0x1449   :  { %2624 = vmatprep.subr.mxu0 %v2861_v0 }
0x144a   :  { %2625 = vmatpush3.msra.mxu0 %v3122_v11 }
0x144b   :  { %2640 = vmatprep.subr.mxu0 %v2861_v0 }
0x1503   :  { %v1292_v23 = vpop.f32.mrf.mxu0 }
0x1504   :  { %v1366_v24 = vadd.f32 %v3262_v1, %v1292_v23 }
0x1505   :  { %v2606_v25 = vpop.f32.mrf.mxu0 }
0x1506   :  { %v1369_v26 = vadd.f32 %v3259_v31, %v1366_v24 }
0x1508   :  { %2805 = vtanh.f32 %v1369_v26  ;;  %v2322_v28 = vmul.f32 -1.442695, %v1369_v26 }
0x150a   :  { %2807 = vpow2.f32 %v2322_v28 }
0x1515   :  { %v2806_v27 = vpop.eup %2805 }
0x1516   :  { %1380 = vrot.lane.b32.xlu1 %v2806_v27, %s2863_s24 }
0x1517   :  { %v2808_v30 = vpop.eup %2807 }
0x1518   :  { %v1373_v32 = vadd.f32 1.0, %v2808_v30 }
0x151a   :  { %2809 = vrcp.f32 %v1373_v32 }
0x1527   :  { %v2810_v33 = vpop.eup %2809 }
0x1528   :  { %v1378_v34 = vsub.f32 1.0, %v2810_v33  ;;  %v1377_v36 = vmul.f32 %v2810_v33, %v1210_v18 }
0x1588   :  { %v1381_v35 = vpop.permute.xlu1 %1380 }
0x1589   :  { %v1383_v37 = vmul.f32 %v1381_v35, %v1378_v34 }
0x158b   :  { %v1384_v38 = vadd.f32 %v1383_v37, %v1377_v36 }
0x158d   :  { %2811 = vtanh.f32 %v1384_v38 }
0x159a   :  { %v2812_v1 = vpop.eup %2811 }
0x159b   :  { %1387 = vrot.lane.b32.xlu0 %v2812_v1, %s2864_s27 }
0x160d   :  { %v1388_v39 = vpop.permute.xlu0 %1387 }
0x160e   :  { %v1390_v41 = vmul.f32 %v2810_v33, %v1388_v39 }
0x1610   :  { %1392 = vrot.lane.b32.xlu1 %v1390_v41, %s2865_s28 }
0x1682   :  { %v1393_v3 = vpop.permute.xlu1 %1392 }
0x1683   :  { %2323 = vst.msk [vmem:[%s3444_s5 + $0x10] sm:$0xff] %vm29_vm0, %v1393_v3  ;;  %2627 = vmatmul.mubr.msk.f32.vlgmr.msra.gmra.mxu0 %vm29_vm0, %v1393_v3 }
0x1684   :  { %2641 = vmatpush3.msra.mxu0 %v3095_v7  ;;  %2648 = vmatprep.mubr.msk.f32.mxu0 %vm2862_vm1, %v2861_v0 }
0x1685   :  { %2642 = vmatprep.subr.mxu0 %v2861_v0 }
0x1686   :  { %2643 = vmatpush3.msra.mxu0 %v3108_v9 }
0x1687   :  { %2644 = vmatprep.subr.mxu0 %v2861_v0 }
0x1688   :  { %2645 = vmatpush3.msra.mxu0 %v3115_v10 }
0x1689   :  { %2646 = vmatprep.subr.mxu0 %v2861_v0 }
0x168a   :  { %2647 = vmatpush3.msra.mxu0 %v3122_v11 }
0x168b   :  { %2662 = vmatprep.subr.mxu0 %v2861_v0 }
0x1743   :  { %v1466_v43 = vpop.f32.mrf.mxu0 }
0x1744   :  { %v1540_v44 = vadd.f32 %v3265_v40, %v1466_v43 }
0x1745   :  { %v2628_v45 = vpop.f32.mrf.mxu0 }
0x1746   :  { %v1543_v46 = vadd.f32 %v3259_v31, %v1540_v44 }
0x1748   :  { %2813 = vtanh.f32 %v1543_v46  ;;  %v2326_v48 = vmul.f32 -1.442695, %v1543_v46 }
0x174a   :  { %2815 = vpow2.f32 %v2326_v48 }
0x1755   :  { %v2814_v47 = vpop.eup %2813 }
0x1756   :  { %1554 = vrot.lane.b32.xlu0 %v2814_v47, %s2863_s24 }
0x1757   :  { %v2816_v49 = vpop.eup %2815 }
0x1758   :  { %v1547_v50 = vadd.f32 1.0, %v2816_v49 }
0x175a   :  { %2817 = vrcp.f32 %v1547_v50 }
0x1767   :  { %v2818_v51 = vpop.eup %2817 }
0x1768   :  { %v1552_v52 = vsub.f32 1.0, %v2818_v51  ;;  %v1551_v54 = vmul.f32 %v2818_v51, %v1384_v38 }
0x17c8   :  { %v1555_v53 = vpop.permute.xlu0 %1554 }
0x17c9   :  { %v1557_v55 = vmul.f32 %v1555_v53, %v1552_v52 }
0x17cb   :  { %v1558_v56 = vadd.f32 %v1557_v55, %v1551_v54 }
0x17cd   :  { %2819 = vtanh.f32 %v1558_v56 }
0x17da   :  { %v2820_v40 = vpop.eup %2819 }
0x17db   :  { %1561 = vrot.lane.b32.xlu1 %v2820_v40, %s2864_s27 }
0x184d   :  { %v1562_v57 = vpop.permute.xlu1 %1561 }
0x184e   :  { %v1564_v58 = vmul.f32 %v2818_v51, %v1562_v57 }
0x1850   :  { %1566 = vrot.lane.b32.xlu0 %v1564_v58, %s2865_s28 }
0x18c2   :  { %v1567_v59 = vpop.permute.xlu0 %1566 }
0x18c3   :  { %2327 = vst.msk [vmem:[%s3444_s5 + $0x18] sm:$0xff] %vm29_vm0, %v1567_v59  ;;  %2649 = vmatmul.mubr.msk.f32.vlgmr.msra.gmra.mxu0 %vm29_vm0, %v1567_v59 }
0x18c4   :  { %2663 = vmatpush3.msra.mxu0 %v3095_v7  ;;  %2670 = vmatprep.mubr.msk.f32.mxu0 %vm2862_vm1, %v2861_v0 }
0x18c5   :  { %2664 = vmatprep.subr.mxu0 %v2861_v0 }
0x18c6   :  { %2665 = vmatpush3.msra.mxu0 %v3108_v9 }
0x18c7   :  { %2666 = vmatprep.subr.mxu0 %v2861_v0 }
0x18c8   :  { %2667 = vmatpush3.msra.mxu0 %v3115_v10 }
0x18c9   :  { %2668 = vmatprep.subr.mxu0 %v2861_v0 }
0x18ca   :  { %2669 = vmatpush3.msra.mxu0 %v3122_v11 }
0x18cb   :  { %2684 = vmatprep.subr.mxu0 %v2861_v0 }
0x1983   :  { %v1640_v60 = vpop.f32.mrf.mxu0 }
0x1984   :  { %v1714_v61 = vadd.f32 %v3267_v2, %v1640_v60 }
0x1985   :  { %v2650_v62 = vpop.f32.mrf.mxu0 }
0x1986   :  { %v1717_v63 = vadd.f32 %v3259_v31, %v1714_v61 }
0x1988   :  { %2821 = vtanh.f32 %v1717_v63  ;;  %v2330_v8 = vmul.f32 -1.442695, %v1717_v63 }
0x198a   :  { %2823 = vpow2.f32 %v2330_v8 }
0x1995   :  { %v2822_v5 = vpop.eup %2821 }
0x1996   :  { %1728 = vrot.lane.b32.xlu1 %v2822_v5, %s2863_s24 }
0x1997   :  { %v2824_v12 = vpop.eup %2823 }
0x1998   :  { %v1721_v13 = vadd.f32 1.0, %v2824_v12 }
0x199a   :  { %2825 = vrcp.f32 %v1721_v13 }
0x19a7   :  { %v2826_v14 = vpop.eup %2825 }
0x19a8   :  { %v1726_v15 = vsub.f32 1.0, %v2826_v14  ;;  %v1725_v17 = vmul.f32 %v2826_v14, %v1558_v56 }
0x1a08   :  { %v1729_v16 = vpop.permute.xlu1 %1728 }
0x1a09   :  { %v1731_v18 = vmul.f32 %v1729_v16, %v1726_v15 }
0x1a0b   :  { %v1732_v19 = vadd.f32 %v1731_v18, %v1725_v17 }
0x1a0d   :  { %2827 = vtanh.f32 %v1732_v19 }
0x1a1a   :  { %v2828_v2 = vpop.eup %2827 }
0x1a1b   :  { %1735 = vrot.lane.b32.xlu0 %v2828_v2, %s2864_s27 }
0x1a8d   :  { %v1736_v20 = vpop.permute.xlu0 %1735 }
0x1a8e   :  { %v1738_v21 = vmul.f32 %v2826_v14, %v1736_v20 }
0x1a90   :  { %1740 = vrot.lane.b32.xlu1 %v1738_v21, %s2865_s28 }
0x1b02   :  { %v1741_v22 = vpop.permute.xlu1 %1740 }
0x1b03   :  { %2331 = vst.msk [vmem:[%s3444_s5 + $0x20] sm:$0xff] %vm29_vm0, %v1741_v22  ;;  %2671 = vmatmul.mubr.msk.f32.vlgmr.msra.gmra.mxu0 %vm29_vm0, %v1741_v22 }
0x1b04   :  { %2685 = vmatpush3.msra.mxu0 %v3095_v7  ;;  %2692 = vmatprep.mubr.msk.f32.mxu0 %vm2862_vm1, %v2861_v0 }
0x1b05   :  { %2686 = vmatprep.subr.mxu0 %v2861_v0 }
0x1b06   :  { %2687 = vmatpush3.msra.mxu0 %v3108_v9 }
0x1b07   :  { %2688 = vmatprep.subr.mxu0 %v2861_v0 }
0x1b08   :  { %2689 = vmatpush3.msra.mxu0 %v3115_v10 }
0x1b09   :  { %2690 = vmatprep.subr.mxu0 %v2861_v0 }
0x1b0a   :  { %2691 = vmatpush3.msra.mxu0 %v3122_v11 }
0x1b0b   :  { %2706 = vmatprep.subr.mxu0 %v2861_v0 }
0x1bc3   :  { %v1814_v23 = vpop.f32.mrf.mxu0 }
0x1bc4   :  { %v1888_v24 = vadd.f32 %v3269_v42, %v1814_v23  ;;  %v2309_v42 = vld [vmem:[%s3438_s0 + $0x38] sm:$0xff] }
0x1bc5   :  { %v2672_v25 = vpop.f32.mrf.mxu0  ;;  %v828_v1 = vadd.f32 %v2309_v42, %v3254_v29 }
0x1bc6   :  { %v1891_v26 = vadd.f32 %v3259_v31, %v1888_v24 }
0x1bc7   :  { %v2311_v3 = vmul.f32 -1.442695, %v828_v1 }
0x1bc8   :  { %2829 = vtanh.f32 %v1891_v26  ;;  %v2334_v28 = vmul.f32 -1.442695, %v1891_v26 }
0x1bca   :  { %2831 = vpow2.f32 %v2334_v28 }
0x1bd5   :  { %v2830_v27 = vpop.eup %2829 }
0x1bd6   :  { %1902 = vrot.lane.b32.xlu0 %v2830_v27, %s2863_s24 }
0x1bd7   :  { %v2832_v30 = vpop.eup %2831 }
0x1bd8   :  { %v1895_v32 = vadd.f32 1.0, %v2832_v30 }
0x1bda   :  { %2833 = vrcp.f32 %v1895_v32 }
0x1be7   :  { %v2834_v33 = vpop.eup %2833 }
0x1be8   :  { %v1900_v34 = vsub.f32 1.0, %v2834_v33  ;;  %v1899_v36 = vmul.f32 %v2834_v33, %v1732_v19 }
0x1c48   :  { %v1903_v35 = vpop.permute.xlu0 %1902 }
0x1c49   :  { %v1905_v37 = vmul.f32 %v1903_v35, %v1900_v34 }
0x1c4b   :  { %v1906_v38 = vadd.f32 %v1905_v37, %v1899_v36 }
0x1c4d   :  { %2835 = vtanh.f32 %v1906_v38 }
0x1c4e   :  { %2837 = vtanh.f32 %v828_v1 }
0x1c4f   :  { %2839 = vpow2.f32 %v2311_v3 }
0x1c5a   :  { %v2836_v39 = vpop.eup %2835 }
0x1c5b   :  { %1909 = vrot.lane.b32.xlu1 %v2836_v39, %s2864_s27  ;;  %v2838_v41 = vpop.eup %2837 }
0x1c5c   :  { %v2840_v43 = vpop.eup %2839 }
0x1c5d   :  { %v832_v44 = vadd.f32 1.0, %v2840_v43 }
0x1c5f   :  { %839 = vrot.lane.b32.xlu1 %v2838_v41, %s2863_s24  ;;  %2841 = vrcp.f32 %v832_v44 }
0x1c6c   :  { %v2842_v45 = vpop.eup %2841 }
0x1c6d   :  { %v837_v48 = vsub.f32 1.0, %v2842_v45  ;;  %v836_v49 = vmul.f32 %v2842_v45, %v3089_v6 }
0x1ccd   :  { %v1910_v46 = vpop.permute.xlu1 %1909 }
0x1cce   :  { %v1912_v47 = vmul.f32 %v2834_v33, %v1910_v46 }
0x1cd0   :  { %1914 = vrot.lane.b32.xlu0 %v1912_v47, %s2865_s28 }
0x1cd1   :  { %v840_v29 = vpop.permute.xlu1 %839 }
0x1cd2   :  { %v842_v50 = vmul.f32 %v840_v29, %v837_v48 }
0x1cd4   :  { %v843_v51 = vadd.f32 %v842_v50, %v836_v49 }
0x1cd6   :  { %2843 = vtanh.f32 %v843_v51  ;;  %857 = vst.msk [vmem:[%s3437_s7] sm:$0xff] %vm29_vm0, %v843_v51 }
0x1ce3   :  { %v2844_v52 = vpop.eup %2843 }
0x1ce4   :  { %846 = vrot.lane.b32.xlu1 %v2844_v52, %s2864_s27 }
0x1d42   :  { %v1915_v53 = vpop.permute.xlu0 %1914 }
0x1d43   :  { %2335 = vst.msk [vmem:[%s3444_s5 + $0x28] sm:$0xff] %vm29_vm0, %v1915_v53  ;;  %2693 = vmatmul.mubr.msk.f32.vlgmr.msra.gmra.mxu0 %vm29_vm0, %v1915_v53 }
0x1d44   :  { %2707 = vmatpush3.msra.mxu0 %v3095_v7  ;;  %2714 = vmatprep.mubr.msk.f32.mxu0 %vm2862_vm1, %v2861_v0 }
0x1d45   :  { %2708 = vmatprep.subr.mxu0 %v2861_v0 }
0x1d46   :  { %2709 = vmatpush3.msra.mxu0 %v3108_v9 }
0x1d47   :  { %2710 = vmatprep.subr.mxu0 %v2861_v0 }
0x1d48   :  { %2711 = vmatpush3.msra.mxu0 %v3115_v10 }
0x1d49   :  { %2712 = vmatprep.subr.mxu0 %v2861_v0 }
0x1d4a   :  { %2713 = vmatpush3.msra.mxu0 %v3122_v11 }
0x1d56   :  { %v847_v6 = vpop.permute.xlu1 %846 }
0x1d57   :  { %v849_v54 = vmul.f32 %v2842_v45, %v847_v6 }
0x1d59   :  { %851 = vrot.lane.b32.xlu1 %v849_v54, %s2865_s28 }
0x1dcb   :  { %v852_v7 = vpop.permute.xlu1 %851 }
0x1dcc   :  { %855 = vst.msk [vmem:[#allocation2 + $0x38] sm:$0xff] %vm29_vm0, %v852_v7  ;;  %856 = vst.msk [vmem:[%s3436_s6] sm:$0xff] %vm29_vm0, %v852_v7 }
0x1dd3   :  { %v2093_v9 = vld [vmem:[#allocation2 + $0x38] sm:$0xff] }
0x1dd4   :  { %2726 = vmatmul.mubr.msk.f32.vlgmr.msra.gmra.mxu1 %vm29_vm0, %v2093_v9 }
0x1e03   :  { %v1988_v10 = vpop.f32.mrf.mxu0 }
0x1e04   :  { %v2062_v0 = vadd.f32 %v3271_v4, %v1988_v10 }
0x1e05   :  { %v2694_v55 = vpop.f32.mrf.mxu0 }
0x1e06   :  { %v2065_v11 = vadd.f32 %v3259_v31, %v2062_v0 }
0x1e08   :  { %2845 = vtanh.f32 %v2065_v11  ;;  %v2338_v40 = vmul.f32 -1.442695, %v2065_v11 }
0x1e0a   :  { %2847 = vpow2.f32 %v2338_v40 }
0x1e15   :  { %v2846_v56 = vpop.eup %2845 }
0x1e16   :  { %2076 = vrot.lane.b32.xlu0 %v2846_v56, %s2863_s24 }
0x1e17   :  { %v2848_v57 = vpop.eup %2847 }
0x1e18   :  { %v2069_v58 = vadd.f32 1.0, %v2848_v57 }
0x1e1a   :  { %2849 = vrcp.f32 %v2069_v58 }
0x1e27   :  { %v2850_v59 = vpop.eup %2849 }
0x1e28   :  { %v2074_v60 = vsub.f32 1.0, %v2850_v59  ;;  %v2073_v62 = vmul.f32 %v2850_v59, %v1906_v38 }
0x1e88   :  { %v2077_v61 = vpop.permute.xlu0 %2076 }
0x1e89   :  { %v2079_v63 = vmul.f32 %v2077_v61, %v2074_v60 }
0x1e8b   :  { %v2080_v5 = vadd.f32 %v2079_v63, %v2073_v62 }
0x1e8d   :  { %2851 = vtanh.f32 %v2080_v5 }
0x1e94   :  { %v2235_v4 = vpop.f32.mrf.mxu1 }
0x1e96   :  { %v2727_v8 = vpop.f32.mrf.mxu1 }
0x1e9a   :  { %v2852_v12 = vpop.eup %2851 }
0x1e9b   :  { %2083 = vrot.lane.b32.xlu0 %v2852_v12, %s2864_s27 }
0x1f0d   :  { %v2084_v13 = vpop.permute.xlu0 %2083 }
0x1f0e   :  { %v2086_v14 = vmul.f32 %v2850_v59, %v2084_v13 }
0x1f10   :  { %2088 = vrot.lane.b32.xlu0 %v2086_v14, %s2865_s28 }
0x1f82   :  { %v2089_v15 = vpop.permute.xlu0 %2088 }
0x1f83   :  { %2339 = vst.msk [vmem:[%s3444_s5 + $0x30] sm:$0xff] %vm29_vm0, %v2089_v15  ;;  %2715 = vmatmul.mubr.msk.f32.vlgmr.msra.gmra.mxu0 %vm29_vm0, %v2089_v15 }
0x2043   :  { %v2162_v16 = vpop.f32.mrf.mxu0 }
0x2044   :  { %v2236_v17 = vadd.f32 %v2235_v4, %v2162_v16 }
0x2045   :  { %v2716_v18 = vpop.f32.mrf.mxu0 }
0x2046   :  { %v2239_v19 = vadd.f32 %v3259_v31, %v2236_v17 }
0x2048   :  { %2853 = vtanh.f32 %v2239_v19  ;;  %v2342_v20 = vmul.f32 -1.442695, %v2239_v19 }
0x204a   :  { %2855 = vpow2.f32 %v2342_v20 }
0x2055   :  { %v2854_v2 = vpop.eup %2853 }
0x2056   :  { %2250 = vrot.lane.b32.xlu1 %v2854_v2, %s2863_s24 }
0x2057   :  { %v2856_v21 = vpop.eup %2855 }
0x2058   :  { %v2243_v22 = vadd.f32 1.0, %v2856_v21 }
0x205a   :  { %2857 = vrcp.f32 %v2243_v22 }
0x2067   :  { %v2858_v23 = vpop.eup %2857 }
0x2068   :  { %v2248_v24 = vsub.f32 1.0, %v2858_v23  ;;  %v2247_v26 = vmul.f32 %v2858_v23, %v2080_v5 }
0x20c8   :  { %v2251_v25 = vpop.permute.xlu1 %2250 }
0x20c9   :  { %v2253_v27 = vmul.f32 %v2251_v25, %v2248_v24 }
0x20cb   :  { %v2254_v28 = vadd.f32 %v2253_v27, %v2247_v26 }
0x20cd   :  { %2859 = vtanh.f32 %v2254_v28  ;;  %2268 = vst.msk [vmem:[%s3442_s9] sm:$0xff] %vm29_vm0, %v2254_v28 }
0x20da   :  { %v2860_v31 = vpop.eup %2859 }
0x20db   :  { %2257 = vrot.lane.b32.xlu0 %v2860_v31, %s2864_s27 }
0x214d   :  { %v2258_v30 = vpop.permute.xlu0 %2257 }
0x214e   :  { %v2260_v32 = vmul.f32 %v2858_v23, %v2258_v30 }
0x2150   :  { %2262 = vrot.lane.b32.xlu1 %v2260_v32, %s2865_s28 }
0x21c2   :  { %v2263_v33 = vpop.permute.xlu1 %2262 }
0x21c3   :  { %2343 = vst.msk [vmem:[%s3444_s5 + $0x38] sm:$0xff] %vm29_vm0, %v2263_v33  ;;  %2267 = vst.msk [vmem:[%s3440_s8] sm:$0xff] %vm29_vm0, %v2263_v33 }

</bundles_post_ra>
